<compile_context>
chip_gen: v7x
topology: tpu7x:2x2x1
jax: 0.10.0
libtpu: 0.0.40
codegen_flags: <defaults>
</compile_context>

<pallas_src>
import functools

import jax
import jax.numpy as jnp
from jax import lax
from jax.experimental import pallas as pl
from jax.experimental.pallas import tpu as pltpu

VOCAB = 64
TYPE_VOCAB = 2
MAX_POS = 16
HIDDEN = 32
NUM_HEADS = 4
HEAD_DIM = HIDDEN // NUM_HEADS
INTERMEDIATE = 64
NUM_LAYERS = 2
OUT_PAD = 128          # lane-dense padded width for the 2-logit head
LN_EPS = 1e-12
NEG_INF = -1e9

MXU_DTYPE = jnp.bfloat16   # bf16 MXU inputs / bf16 weight storage, f32 accumulation


def _mxu_dot(a_f32, w_bf16):
    # Weights live in HBM/VMEM as bf16 already; only cast the activation.
    return jnp.dot(a_f32.astype(MXU_DTYPE), w_bf16,
                   preferred_element_type=jnp.float32)


def _layer_norm(h, g, b, eps):
    mean = jnp.mean(h, axis=-1, keepdims=True)
    var = jnp.mean(jnp.square(h - mean), axis=-1, keepdims=True)
    return (h - mean) * lax.rsqrt(var + eps) * g + b


def _gelu(y):
    # TODO(synk): HF BERT default is the exact (erf) GELU; tanh approximation used here.
    return 0.5 * y * (1.0 + jnp.tanh(0.7978845608028654 * (y + 0.044715 * y * y * y)))


# ----------------------------- fused encoder kernel -------------------------


def _encoder_kernel(
    emb_ref, bias_ref, cvec_ref,
    wqkv_ref, wo_ref, wff1_ref, wff2_ref, wout_ref, vecs_ref,
    out_ref,
    hid_ref,
    *, hidden, num_heads, head_dim, inter, scale):
    layer = pl.program_id(1)

    # Small per-layer params, packed into one (8, 3H) tile (one DMA stream).
    v = vecs_ref[0]
    bqkv = v[0:1, :]
    bo = v[1:2, :hidden]
    ln1g = v[2:3, :hidden]
    ln1b = v[3:4, :hidden]
    bff1 = v[4:5, :inter]
    bff2 = v[5:6, :hidden]
    ln2g = v[6:7, :hidden]
    ln2b = v[7:8, :hidden]

    # Embedding LayerNorm folded into the first layer iteration.
    @pl.when(layer == 0)
    def _():
        hid_ref[...] = _layer_norm(
            emb_ref[...], cvec_ref[0:1, :hidden], cvec_ref[1:2, :hidden], LN_EPS)

    x = hid_ref[...]                                               # (M, H) f32

    # Fused Q/K/V projection: one (M, H) x (H, 3H) bf16 matmul, f32 acc.
    qkv = _mxu_dot(x, wqkv_ref[0]) + bqkv                          # (M, 3H) f32

    # Hoisted out of the head loop: pre-scale Q, single bf16 cast of Q/K/V.
    q_all = (qkv[:, :hidden] * scale).astype(MXU_DTYPE)
    k_all = qkv[:, hidden:2 * hidden].astype(MXU_DTYPE)
    v_all = qkv[:, 2 * hidden:].astype(MXU_DTYPE)

    # Additive attention bias (key padding + cross-batch-row blocking),
    # precomputed at exact (M, M) shape: no per-head broadcast needed.
    bias = bias_ref[0]

    ctx_parts = []
    for h in range(num_heads):
        qh = q_all[:, h * head_dim:(h + 1) * head_dim]             # (M, D) bf16
        kh = k_all[:, h * head_dim:(h + 1) * head_dim]
        vh = v_all[:, h * head_dim:(h + 1) * head_dim]
        # q @ k^T via dot_general contracting dim 1 with dim 1 (no explicit .T).
        s = lax.dot_general(qh, kh, (((1,), (1,)), ((), ())),
                            preferred_element_type=jnp.float32) + bias
        s = s - jnp.max(s, axis=-1, keepdims=True)
        p = jnp.exp(s)
        p = p * pl.reciprocal(jnp.sum(p, axis=-1, keepdims=True), approx=True)
        ctx_parts.append(jnp.dot(p.astype(MXU_DTYPE), vh,
                                 preferred_element_type=jnp.float32))
    # Merge heads into one lane-dense (M, H) value (no masked strip stores).
    ctx = jnp.concatenate(ctx_parts, axis=-1)

    # Attention output projection + Add & LayerNorm.
    attn = _mxu_dot(ctx, wo_ref[0]) + bo
    x1 = _layer_norm(attn + x, ln1g, ln1b, LN_EPS)

    # FFN (GELU) + Add & LayerNorm.
    ff = _gelu(_mxu_dot(x1, wff1_ref[0]) + bff1)
    ff2 = _mxu_dot(ff, wff2_ref[0]) + bff2
    x2 = _layer_norm(ff2 + x1, ln2g, ln2b, LN_EPS)

    hid_ref[...] = x2

    # Final head fused into the last layer: Linear(H, 2) padded to 128 lanes.
    # TODO(synk): nn.Dropout(0.1) is a no-op in eval mode; training-mode dropout not implemented.
    @pl.when(layer == pl.num_programs(1) - 1)
    def _():
        out_ref[...] = _mxu_dot(x2, wout_ref[...]) + cvec_ref[2:3, :]


# ----------------------------- model definition ------------------------------


def init_params(key):
    def nrm(key, shape, scale=0.02):
        return scale * jax.random.normal(key, shape, dtype=jnp.float32)

    keys = iter(jax.random.split(key, 8 + NUM_LAYERS * 16))
    p = {
        "word_emb": nrm(next(keys), (VOCAB, HIDDEN)),
        "pos_emb": nrm(next(keys), (MAX_POS, HIDDEN)),
        "type_emb": nrm(next(keys), (TYPE_VOCAB, HIDDEN)),
        "emb_ln_g": jnp.ones((HIDDEN,), jnp.float32),
        "emb_ln_b": jnp.zeros((HIDDEN,), jnp.float32),
        "out_w": nrm(next(keys), (HIDDEN, 2)),
        "out_b": jnp.zeros((2,), jnp.float32),
        "layers": [],
    }
    for _ in range(NUM_LAYERS):
        layer = {
            "wq": nrm(next(keys), (HIDDEN, HIDDEN)),
            "bq": jnp.zeros((HIDDEN,), jnp.float32),
            "wk": nrm(next(keys), (HIDDEN, HIDDEN)),
            "bk": jnp.zeros((HIDDEN,), jnp.float32),
            "wv": nrm(next(keys), (HIDDEN, HIDDEN)),
            "bv": jnp.zeros((HIDDEN,), jnp.float32),
            "wo": nrm(next(keys), (HIDDEN, HIDDEN)),
            "bo": jnp.zeros((HIDDEN,), jnp.float32),
            "ln1_g": jnp.ones((HIDDEN,), jnp.float32),
            "ln1_b": jnp.zeros((HIDDEN,), jnp.float32),
            "w_ff1": nrm(next(keys), (HIDDEN, INTERMEDIATE)),
            "b_ff1": jnp.zeros((INTERMEDIATE,), jnp.float32),
            "w_ff2": nrm(next(keys), (INTERMEDIATE, HIDDEN)),
            "b_ff2": jnp.zeros((HIDDEN,), jnp.float32),
            "ln2_g": jnp.ones((HIDDEN,), jnp.float32),
            "ln2_b": jnp.zeros((HIDDEN,), jnp.float32),
        }
        p["layers"].append(layer)
    return p


def tweet_model_forward(params, ids, mask, token_type_ids, *, batch_block=None):
    B, S = ids.shape
    TB = B if batch_block is None else batch_block     # batch rows per grid step
    assert B % TB == 0
    NB = B // TB
    Mb = TB * S                                         # folded rows per step

    # Embedding gathers are glue in plain JAX (data-dependent gather).
    positions = jnp.arange(S)
    emb = (params["word_emb"][ids]
           + params["pos_emb"][positions][None, :, :]
           + params["type_emb"][token_type_ids]).astype(jnp.float32)   # (B, S, H)
    emb = emb.reshape(B * S, HIDDEN)                                    # folded

    # Precompute the exact (Mb, Mb) additive attention bias per batch block:
    # key-padding mask plus -inf between different batch rows folded into the
    # same slab (block-diagonal attention).
    key_bias = (1.0 - mask.astype(jnp.float32)) * NEG_INF               # (B, S)
    row_id = jnp.repeat(jnp.arange(TB), S)
    same_row = (row_id[:, None] == row_id[None, :])

    def _block_bias(bb):
        kb = key_bias[bb * TB:(bb + 1) * TB].reshape(Mb)
        return jnp.where(same_row, kb[None, :], jnp.float32(NEG_INF))

    attn_bias = jnp.stack([_block_bias(bb) for bb in range(NB)])        # (NB, Mb, Mb)

    layers = params["layers"]
    # Big weights: per-layer stacks stored as bf16 (half the weight DMA bytes).
    wqkv = jnp.stack([jnp.concatenate([lp["wq"], lp["wk"], lp["wv"]], axis=1)
                      for lp in layers]).astype(MXU_DTYPE)              # (L, H, 3H)
    wo = jnp.stack([lp["wo"] for lp in layers]).astype(MXU_DTYPE)       # (L, H, H)
    wff1 = jnp.stack([lp["w_ff1"] for lp in layers]).astype(MXU_DTYPE)  # (L, H, I)
    wff2 = jnp.stack([lp["w_ff2"] for lp in layers]).astype(MXU_DTYPE)  # (L, I, H)
    out_w_p = (jnp.zeros((HIDDEN, OUT_PAD), jnp.float32)
               .at[:, :2].set(params["out_w"])).astype(MXU_DTYPE)       # (H, 128)

    # Small per-layer params packed into ONE (L, 8, 3H) array.
    W3 = 3 * HIDDEN

    def _pad_row(vec):
        return jnp.zeros((W3,), jnp.float32).at[:vec.shape[0]].set(vec)

    def _pack(lp):
        return jnp.stack([
            _pad_row(jnp.concatenate([lp["bq"], lp["bk"], lp["bv"]])),
            _pad_row(lp["bo"]), _pad_row(lp["ln1_g"]), _pad_row(lp["ln1_b"]),
            _pad_row(lp["b_ff1"]), _pad_row(lp["b_ff2"]),
            _pad_row(lp["ln2_g"]), _pad_row(lp["ln2_b"])])

    vecs = jnp.stack([_pack(lp) for lp in layers])                      # (L, 8, 3H)

    # Const vectors: embedding-LN gamma/beta + padded head bias in one tile.
    cvec = (jnp.zeros((8, OUT_PAD), jnp.float32)
            .at[0, :HIDDEN].set(params["emb_ln_g"])
            .at[1, :HIDDEN].set(params["emb_ln_b"])
            .at[2, :2].set(params["out_b"]))

    kernel = functools.partial(
        _encoder_kernel,
        hidden=HIDDEN, num_heads=NUM_HEADS, head_dim=HEAD_DIM,
        inter=INTERMEDIATE, scale=1.0 / (HEAD_DIM ** 0.5))

    def layer_spec(a):
        return pl.BlockSpec((1,) + a.shape[1:], lambda b, l: (l, 0, 0))

    out = pl.pallas_call(
        kernel,
        out_shape=jax.ShapeDtypeStruct((B * S, OUT_PAD), jnp.float32),
        grid=(NB, NUM_LAYERS),
        in_specs=[
            pl.BlockSpec((Mb, HIDDEN), lambda b, l: (b, 0)),            # embeddings
            pl.BlockSpec((1, Mb, Mb), lambda b, l: (b, 0, 0)),          # attn bias
            pl.BlockSpec((8, OUT_PAD), lambda b, l: (0, 0)),            # const vecs
            layer_spec(wqkv), layer_spec(wo),
            layer_spec(wff1), layer_spec(wff2),
            pl.BlockSpec((HIDDEN, OUT_PAD), lambda b, l: (0, 0)),       # head weight
            layer_spec(vecs),
        ],
        out_specs=pl.BlockSpec((Mb, OUT_PAD), lambda b, l: (b, 0)),
        scratch_shapes=[
            pltpu.VMEM((Mb, HIDDEN), jnp.float32),   # hidden-state carry across layers
        ],
        compiler_params=pltpu.CompilerParams(
            dimension_semantics=("parallel", "arbitrary"),
            vmem_limit_bytes=32 * 1024 * 1024),
    )(emb, attn_bias, cvec, wqkv, wo, wff1, wff2, out_w_p, vecs)

    out = out.reshape(B, S, OUT_PAD)
    start_logits = out[:, :, 0]                         # squeeze(-1) of split
    end_logits = out[:, :, 1]
    return start_logits, end_logits


# --------------------------------- main --------------------------------------

if __name__ == "__main__":
    B, S = 2, 8
    key = jax.random.PRNGKey(0)
    k_ids, k_tok, k_params = jax.random.split(key, 3)

    ids = jax.random.randint(k_ids, (B, S), 0, VOCAB, dtype=jnp.int32)
    mask = jnp.array(
        [[1, 1, 1, 1, 1, 1, 1, 1],
         [1, 1, 1, 1, 1, 1, 0, 0]], dtype=jnp.int32
    )
    token_type_ids = jax.random.randint(k_tok, (B, S), 0, TYPE_VOCAB, dtype=jnp.int32)

    params = init_params(k_params)

    start_logits, end_logits = tweet_model_forward(params, ids, mask, token_type_ids)
    jax.block_until_ready((start_logits, end_logits))

    assert start_logits.shape == (B, S) and end_logits.shape == (B, S)
    print("KERNEL_OK")
</pallas_src>

<mosaic_0001>
module attributes {stable_mosaic.version = 11 : i64} {
  func.func @_encoder_kernel(%arg0: i32, %arg1: i32, %arg2: memref<16x32xf32, #tpu.memory_space<vmem>>, %arg3: memref<1x16x16xf32, #tpu.memory_space<vmem>>, %arg4: memref<8x128xf32, #tpu.memory_space<vmem>>, %arg5: memref<1x32x96xbf16, #tpu.memory_space<vmem>>, %arg6: memref<1x32x32xbf16, #tpu.memory_space<vmem>>, %arg7: memref<1x32x64xbf16, #tpu.memory_space<vmem>>, %arg8: memref<1x64x32xbf16, #tpu.memory_space<vmem>>, %arg9: memref<32x128xbf16, #tpu.memory_space<vmem>>, %arg10: memref<1x8x96xf32, #tpu.memory_space<vmem>>, %arg11: memref<16x128xf32, #tpu.memory_space<vmem>>, %arg12: memref<16x32xf32, #tpu.memory_space<vmem>>) attributes {dimension_semantics = [#tpu.dimension_semantics<parallel>, #tpu.dimension_semantics<arbitrary>], iteration_bounds = array<i64: 1, 2>, scalar_prefetch = 0 : i64, scratch_operands = 1 : i64, tpu.core_type = #tpu.core_type<tc>, window_params = [{transform_indices = @transform_0, window_bounds = array<i64: 16, 32>}, {transform_indices = @transform_1, window_bounds = array<i64: 1, 16, 16>}, {pipeline_mode = #tpu.pipeline_mode<synchronous>, transform_indices = @transform_2, window_bounds = array<i64: 8, 128>}, {transform_indices = @transform_3, window_bounds = array<i64: 1, 32, 96>}, {transform_indices = @transform_4, window_bounds = array<i64: 1, 32, 32>}, {transform_indices = @transform_5, window_bounds = array<i64: 1, 32, 64>}, {transform_indices = @transform_6, window_bounds = array<i64: 1, 64, 32>}, {pipeline_mode = #tpu.pipeline_mode<synchronous>, transform_indices = @transform_7, window_bounds = array<i64: 32, 128>}, {transform_indices = @transform_8, window_bounds = array<i64: 1, 8, 96>}, {transform_indices = @transform_9, window_bounds = array<i64: 16, 128>}]} {
    %c0 = arith.constant 0 : index
    %c0_0 = arith.constant 0 : index
    %c0_1 = arith.constant 0 : index
    %0 = vector.load %arg10[%c0, %c0_0, %c0_1] : memref<1x8x96xf32, #tpu.memory_space<vmem>>, vector<1x8x96xf32>
    %1 = vector.shape_cast %0 : vector<1x8x96xf32> to vector<8x96xf32>
    %2 = vector.extract_strided_slice %1 {offsets = [0, 0], sizes = [1, 96], strides = [1, 1]} : vector<8x96xf32> to vector<1x96xf32>
    %3 = vector.extract_strided_slice %1 {offsets = [1, 0], sizes = [1, 32], strides = [1, 1]} : vector<8x96xf32> to vector<1x32xf32>
    %4 = vector.extract_strided_slice %1 {offsets = [2, 0], sizes = [1, 32], strides = [1, 1]} : vector<8x96xf32> to vector<1x32xf32>
    %5 = vector.extract_strided_slice %1 {offsets = [3, 0], sizes = [1, 32], strides = [1, 1]} : vector<8x96xf32> to vector<1x32xf32>
    %6 = vector.extract_strided_slice %1 {offsets = [4, 0], sizes = [1, 64], strides = [1, 1]} : vector<8x96xf32> to vector<1x64xf32>
    %7 = vector.extract_strided_slice %1 {offsets = [5, 0], sizes = [1, 32], strides = [1, 1]} : vector<8x96xf32> to vector<1x32xf32>
    %8 = vector.extract_strided_slice %1 {offsets = [6, 0], sizes = [1, 32], strides = [1, 1]} : vector<8x96xf32> to vector<1x32xf32>
    %9 = vector.extract_strided_slice %1 {offsets = [7, 0], sizes = [1, 32], strides = [1, 1]} : vector<8x96xf32> to vector<1x32xf32>
    %c0_i32 = arith.constant 0 : i32
    %10 = arith.cmpi eq, %arg1, %c0_i32 : i32
    %11 = arith.extui %10 : i1 to i32
    %c0_i32_2 = arith.constant 0 : i32
    %12 = arith.cmpi ne, %11, %c0_i32_2 : i32
    scf.if %12 {
      %c0_57 = arith.constant 0 : index
      %c0_58 = arith.constant 0 : index
      %180 = vector.load %arg2[%c0_57, %c0_58] : memref<16x32xf32, #tpu.memory_space<vmem>>, vector<16x32xf32>
      %c0_59 = arith.constant 0 : index
      %c0_60 = arith.constant 0 : index
      %181 = vector.load %arg4[%c0_59, %c0_60] : memref<8x128xf32, #tpu.memory_space<vmem>>, vector<1x32xf32>
      %c1 = arith.constant 1 : index
      %c0_61 = arith.constant 0 : index
      %182 = vector.load %arg4[%c1, %c0_61] : memref<8x128xf32, #tpu.memory_space<vmem>>, vector<1x32xf32>
      %cst_62 = arith.constant dense<0.000000e+00> : vector<16xf32>
      %183 = vector.multi_reduction <add>, %180, %cst_62 [1] : vector<16x32xf32> to vector<16xf32>
      %184 = vector.shape_cast %183 : vector<16xf32> to vector<16x1xf32>
      %cst_63 = arith.constant 3.200000e+01 : f32
      %185 = vector.broadcast %cst_63 : f32 to vector<16x1xf32>
      %186 = arith.divf %184, %185 : vector<16x1xf32>
      %187 = vector.broadcast %186 : vector<16x1xf32> to vector<16x32xf32>
      %188 = arith.subf %180, %187 : vector<16x32xf32>
      %189 = arith.mulf %188, %188 : vector<16x32xf32>
      %cst_64 = arith.constant dense<0.000000e+00> : vector<16xf32>
      %190 = vector.multi_reduction <add>, %189, %cst_64 [1] : vector<16x32xf32> to vector<16xf32>
      %191 = vector.shape_cast %190 : vector<16xf32> to vector<16x1xf32>
      %cst_65 = arith.constant 3.200000e+01 : f32
      %192 = vector.broadcast %cst_65 : f32 to vector<16x1xf32>
      %193 = arith.divf %191, %192 : vector<16x1xf32>
      %194 = vector.broadcast %186 : vector<16x1xf32> to vector<16x32xf32>
      %195 = arith.subf %180, %194 : vector<16x32xf32>
      %cst_66 = arith.constant 9.99999996E-13 : f32
      %196 = vector.broadcast %cst_66 : f32 to vector<16x1xf32>
      %197 = arith.addf %193, %196 : vector<16x1xf32>
      %198 = math.rsqrt %197 : vector<16x1xf32>
      %199 = vector.broadcast %198 : vector<16x1xf32> to vector<16x32xf32>
      %200 = arith.mulf %195, %199 : vector<16x32xf32>
      %201 = vector.broadcast %181 : vector<1x32xf32> to vector<16x32xf32>
      %202 = arith.mulf %200, %201 : vector<16x32xf32>
      %203 = vector.broadcast %182 : vector<1x32xf32> to vector<16x32xf32>
      %204 = arith.addf %202, %203 : vector<16x32xf32>
      %c0_67 = arith.constant 0 : index
      %c0_68 = arith.constant 0 : index
      %205 = vector.load %arg12[%c0_67, %c0_68] : memref<16x32xf32, #tpu.memory_space<vmem>>, vector<16x32xf32>
      tpu.vector_store %arg12[%c0_67, %c0_68], %204 {strides = array<i32>} : memref<16x32xf32, #tpu.memory_space<vmem>>, vector<16x32xf32>,
    } else {
    }
    %c0_3 = arith.constant 0 : index
    %c0_4 = arith.constant 0 : index
    %13 = vector.load %arg12[%c0_3, %c0_4] : memref<16x32xf32, #tpu.memory_space<vmem>>, vector<16x32xf32>
    %c0_5 = arith.constant 0 : index
    %c0_6 = arith.constant 0 : index
    %c0_7 = arith.constant 0 : index
    %14 = vector.load %arg5[%c0_5, %c0_6, %c0_7] : memref<1x32x96xbf16, #tpu.memory_space<vmem>>, vector<1x32x96xbf16>
    %15 = vector.shape_cast %14 : vector<1x32x96xbf16> to vector<32x96xbf16>
    %16 = arith.truncf %13 : vector<16x32xf32> to vector<16x32xbf16>
    %cst = arith.constant dense<0.000000e+00> : vector<16x96xf32>
    %17 = tpu.matmul %16, %15, %cst {dimension_numbers = #tpu.dot_dimension_numbers<[1], [0], [0], [1], [0, 0, 1, 1], [], []>} : vector<16x32xbf16>, vector<32x96xbf16>, vector<16x96xf32> -> vector<16x96xf32>
    %18 = vector.broadcast %2 : vector<1x96xf32> to vector<16x96xf32>
    %19 = arith.addf %17, %18 : vector<16x96xf32>
    %20 = vector.extract_strided_slice %19 {offsets = [0, 0], sizes = [16, 32], strides = [1, 1]} : vector<16x96xf32> to vector<16x32xf32>
    %cst_8 = arith.constant 0.353553385 : f32
    %21 = vector.broadcast %cst_8 : f32 to vector<16x32xf32>
    %22 = arith.mulf %20, %21 : vector<16x32xf32>
    %23 = arith.truncf %22 : vector<16x32xf32> to vector<16x32xbf16>
    %24 = vector.extract_strided_slice %19 {offsets = [0, 32], sizes = [16, 32], strides = [1, 1]} : vector<16x96xf32> to vector<16x32xf32>
    %25 = arith.truncf %24 : vector<16x32xf32> to vector<16x32xbf16>
    %26 = vector.extract_strided_slice %19 {offsets = [0, 64], sizes = [16, 32], strides = [1, 1]} : vector<16x96xf32> to vector<16x32xf32>
    %27 = arith.truncf %26 : vector<16x32xf32> to vector<16x32xbf16>
    %c0_9 = arith.constant 0 : index
    %c0_10 = arith.constant 0 : index
    %c0_11 = arith.constant 0 : index
    %28 = vector.load %arg3[%c0_9, %c0_10, %c0_11] : memref<1x16x16xf32, #tpu.memory_space<vmem>>, vector<1x16x16xf32>
    %29 = vector.shape_cast %28 : vector<1x16x16xf32> to vector<16x16xf32>
    %30 = vector.extract_strided_slice %23 {offsets = [0, 0], sizes = [16, 8], strides = [1, 1]} : vector<16x32xbf16> to vector<16x8xbf16>
    %31 = vector.extract_strided_slice %25 {offsets = [0, 0], sizes = [16, 8], strides = [1, 1]} : vector<16x32xbf16> to vector<16x8xbf16>
    %32 = vector.extract_strided_slice %27 {offsets = [0, 0], sizes = [16, 8], strides = [1, 1]} : vector<16x32xbf16> to vector<16x8xbf16>
    %cst_12 = arith.constant dense<0.000000e+00> : vector<16x16xf32>
    %33 = tpu.matmul %30, %31, %cst_12 {dimension_numbers = #tpu.dot_dimension_numbers<[1], [1], [0], [0], [0, 0, 1, 0], [], []>} : vector<16x8xbf16>, vector<16x8xbf16>, vector<16x16xf32> -> vector<16x16xf32>
    %34 = arith.addf %33, %29 : vector<16x16xf32>
    %cst_13 = arith.constant dense<0xFF800000> : vector<16xf32>
    %35 = vector.multi_reduction <maximumf>, %34, %cst_13 [1] : vector<16x16xf32> to vector<16xf32>
    %36 = vector.shape_cast %35 : vector<16xf32> to vector<16x1xf32>
    %37 = vector.broadcast %36 : vector<16x1xf32> to vector<16x16xf32>
    %38 = arith.subf %34, %37 : vector<16x16xf32>
    %39 = math.exp %38 : vector<16x16xf32>
    %cst_14 = arith.constant dense<0.000000e+00> : vector<16xf32>
    %40 = vector.multi_reduction <add>, %39, %cst_14 [1] : vector<16x16xf32> to vector<16xf32>
    %41 = vector.shape_cast %40 : vector<16xf32> to vector<16x1xf32>
    %42 = tpu.reciprocal %41 {approx = true} : vector<16x1xf32> -> vector<16x1xf32>
    %43 = vector.broadcast %42 : vector<16x1xf32> to vector<16x16xf32>
    %44 = arith.mulf %39, %43 : vector<16x16xf32>
    %45 = arith.truncf %44 : vector<16x16xf32> to vector<16x16xbf16>
    %cst_15 = arith.constant dense<0.000000e+00> : vector<16x8xf32>
    %46 = tpu.matmul %45, %32, %cst_15 {dimension_numbers = #tpu.dot_dimension_numbers<[1], [0], [0], [1], [0, 0, 1, 1], [], []>} : vector<16x16xbf16>, vector<16x8xbf16>, vector<16x8xf32> -> vector<16x8xf32>
    %47 = vector.extract_strided_slice %23 {offsets = [0, 8], sizes = [16, 8], strides = [1, 1]} : vector<16x32xbf16> to vector<16x8xbf16>
    %48 = vector.extract_strided_slice %25 {offsets = [0, 8], sizes = [16, 8], strides = [1, 1]} : vector<16x32xbf16> to vector<16x8xbf16>
    %49 = vector.extract_strided_slice %27 {offsets = [0, 8], sizes = [16, 8], strides = [1, 1]} : vector<16x32xbf16> to vector<16x8xbf16>
    %cst_16 = arith.constant dense<0.000000e+00> : vector<16x16xf32>
    %50 = tpu.matmul %47, %48, %cst_16 {dimension_numbers = #tpu.dot_dimension_numbers<[1], [1], [0], [0], [0, 0, 1, 0], [], []>} : vector<16x8xbf16>, vector<16x8xbf16>, vector<16x16xf32> -> vector<16x16xf32>
    %51 = arith.addf %50, %29 : vector<16x16xf32>
    %cst_17 = arith.constant dense<0xFF800000> : vector<16xf32>
    %52 = vector.multi_reduction <maximumf>, %51, %cst_17 [1] : vector<16x16xf32> to vector<16xf32>
    %53 = vector.shape_cast %52 : vector<16xf32> to vector<16x1xf32>
    %54 = vector.broadcast %53 : vector<16x1xf32> to vector<16x16xf32>
    %55 = arith.subf %51, %54 : vector<16x16xf32>
    %56 = math.exp %55 : vector<16x16xf32>
    %cst_18 = arith.constant dense<0.000000e+00> : vector<16xf32>
    %57 = vector.multi_reduction <add>, %56, %cst_18 [1] : vector<16x16xf32> to vector<16xf32>
    %58 = vector.shape_cast %57 : vector<16xf32> to vector<16x1xf32>
    %59 = tpu.reciprocal %58 {approx = true} : vector<16x1xf32> -> vector<16x1xf32>
    %60 = vector.broadcast %59 : vector<16x1xf32> to vector<16x16xf32>
    %61 = arith.mulf %56, %60 : vector<16x16xf32>
    %62 = arith.truncf %61 : vector<16x16xf32> to vector<16x16xbf16>
    %cst_19 = arith.constant dense<0.000000e+00> : vector<16x8xf32>
    %63 = tpu.matmul %62, %49, %cst_19 {dimension_numbers = #tpu.dot_dimension_numbers<[1], [0], [0], [1], [0, 0, 1, 1], [], []>} : vector<16x16xbf16>, vector<16x8xbf16>, vector<16x8xf32> -> vector<16x8xf32>
    %64 = vector.extract_strided_slice %23 {offsets = [0, 16], sizes = [16, 8], strides = [1, 1]} : vector<16x32xbf16> to vector<16x8xbf16>
    %65 = vector.extract_strided_slice %25 {offsets = [0, 16], sizes = [16, 8], strides = [1, 1]} : vector<16x32xbf16> to vector<16x8xbf16>
    %66 = vector.extract_strided_slice %27 {offsets = [0, 16], sizes = [16, 8], strides = [1, 1]} : vector<16x32xbf16> to vector<16x8xbf16>
    %cst_20 = arith.constant dense<0.000000e+00> : vector<16x16xf32>
    %67 = tpu.matmul %64, %65, %cst_20 {dimension_numbers = #tpu.dot_dimension_numbers<[1], [1], [0], [0], [0, 0, 1, 0], [], []>} : vector<16x8xbf16>, vector<16x8xbf16>, vector<16x16xf32> -> vector<16x16xf32>
    %68 = arith.addf %67, %29 : vector<16x16xf32>
    %cst_21 = arith.constant dense<0xFF800000> : vector<16xf32>
    %69 = vector.multi_reduction <maximumf>, %68, %cst_21 [1] : vector<16x16xf32> to vector<16xf32>
    %70 = vector.shape_cast %69 : vector<16xf32> to vector<16x1xf32>
    %71 = vector.broadcast %70 : vector<16x1xf32> to vector<16x16xf32>
    %72 = arith.subf %68, %71 : vector<16x16xf32>
    %73 = math.exp %72 : vector<16x16xf32>
    %cst_22 = arith.constant dense<0.000000e+00> : vector<16xf32>
    %74 = vector.multi_reduction <add>, %73, %cst_22 [1] : vector<16x16xf32> to vector<16xf32>
    %75 = vector.shape_cast %74 : vector<16xf32> to vector<16x1xf32>
    %76 = tpu.reciprocal %75 {approx = true} : vector<16x1xf32> -> vector<16x1xf32>
    %77 = vector.broadcast %76 : vector<16x1xf32> to vector<16x16xf32>
    %78 = arith.mulf %73, %77 : vector<16x16xf32>
    %79 = arith.truncf %78 : vector<16x16xf32> to vector<16x16xbf16>
    %cst_23 = arith.constant dense<0.000000e+00> : vector<16x8xf32>
    %80 = tpu.matmul %79, %66, %cst_23 {dimension_numbers = #tpu.dot_dimension_numbers<[1], [0], [0], [1], [0, 0, 1, 1], [], []>} : vector<16x16xbf16>, vector<16x8xbf16>, vector<16x8xf32> -> vector<16x8xf32>
    %81 = vector.extract_strided_slice %23 {offsets = [0, 24], sizes = [16, 8], strides = [1, 1]} : vector<16x32xbf16> to vector<16x8xbf16>
    %82 = vector.extract_strided_slice %25 {offsets = [0, 24], sizes = [16, 8], strides = [1, 1]} : vector<16x32xbf16> to vector<16x8xbf16>
    %83 = vector.extract_strided_slice %27 {offsets = [0, 24], sizes = [16, 8], strides = [1, 1]} : vector<16x32xbf16> to vector<16x8xbf16>
    %cst_24 = arith.constant dense<0.000000e+00> : vector<16x16xf32>
    %84 = tpu.matmul %81, %82, %cst_24 {dimension_numbers = #tpu.dot_dimension_numbers<[1], [1], [0], [0], [0, 0, 1, 0], [], []>} : vector<16x8xbf16>, vector<16x8xbf16>, vector<16x16xf32> -> vector<16x16xf32>
    %85 = arith.addf %84, %29 : vector<16x16xf32>
    %cst_25 = arith.constant dense<0xFF800000> : vector<16xf32>
    %86 = vector.multi_reduction <maximumf>, %85, %cst_25 [1] : vector<16x16xf32> to vector<16xf32>
    %87 = vector.shape_cast %86 : vector<16xf32> to vector<16x1xf32>
    %88 = vector.broadcast %87 : vector<16x1xf32> to vector<16x16xf32>
    %89 = arith.subf %85, %88 : vector<16x16xf32>
    %90 = math.exp %89 : vector<16x16xf32>
    %cst_26 = arith.constant dense<0.000000e+00> : vector<16xf32>
    %91 = vector.multi_reduction <add>, %90, %cst_26 [1] : vector<16x16xf32> to vector<16xf32>
    %92 = vector.shape_cast %91 : vector<16xf32> to vector<16x1xf32>
    %93 = tpu.reciprocal %92 {approx = true} : vector<16x1xf32> -> vector<16x1xf32>
    %94 = vector.broadcast %93 : vector<16x1xf32> to vector<16x16xf32>
    %95 = arith.mulf %90, %94 : vector<16x16xf32>
    %96 = arith.truncf %95 : vector<16x16xf32> to vector<16x16xbf16>
    %cst_27 = arith.constant dense<0.000000e+00> : vector<16x8xf32>
    %97 = tpu.matmul %96, %83, %cst_27 {dimension_numbers = #tpu.dot_dimension_numbers<[1], [0], [0], [1], [0, 0, 1, 1], [], []>} : vector<16x16xbf16>, vector<16x8xbf16>, vector<16x8xf32> -> vector<16x8xf32>
    %98 = tpu.concatenate %46, %63, %80, %97 in 1 : vector<16x8xf32>, vector<16x8xf32>, vector<16x8xf32>, vector<16x8xf32> -> vector<16x32xf32>
    %c0_28 = arith.constant 0 : index
    %c0_29 = arith.constant 0 : index
    %c0_30 = arith.constant 0 : index
    %99 = vector.load %arg6[%c0_28, %c0_29, %c0_30] : memref<1x32x32xbf16, #tpu.memory_space<vmem>>, vector<1x32x32xbf16>
    %100 = vector.shape_cast %99 : vector<1x32x32xbf16> to vector<32x32xbf16>
    %101 = arith.truncf %98 : vector<16x32xf32> to vector<16x32xbf16>
    %cst_31 = arith.constant dense<0.000000e+00> : vector<16x32xf32>
    %102 = tpu.matmul %101, %100, %cst_31 {dimension_numbers = #tpu.dot_dimension_numbers<[1], [0], [0], [1], [0, 0, 1, 1], [], []>} : vector<16x32xbf16>, vector<32x32xbf16>, vector<16x32xf32> -> vector<16x32xf32>
    %103 = vector.broadcast %3 : vector<1x32xf32> to vector<16x32xf32>
    %104 = arith.addf %102, %103 : vector<16x32xf32>
    %105 = arith.addf %104, %13 : vector<16x32xf32>
    %cst_32 = arith.constant dense<0.000000e+00> : vector<16xf32>
    %106 = vector.multi_reduction <add>, %105, %cst_32 [1] : vector<16x32xf32> to vector<16xf32>
    %107 = vector.shape_cast %106 : vector<16xf32> to vector<16x1xf32>
    %cst_33 = arith.constant 3.200000e+01 : f32
    %108 = vector.broadcast %cst_33 : f32 to vector<16x1xf32>
    %109 = arith.divf %107, %108 : vector<16x1xf32>
    %110 = vector.broadcast %109 : vector<16x1xf32> to vector<16x32xf32>
    %111 = arith.subf %105, %110 : vector<16x32xf32>
    %112 = arith.mulf %111, %111 : vector<16x32xf32>
    %cst_34 = arith.constant dense<0.000000e+00> : vector<16xf32>
    %113 = vector.multi_reduction <add>, %112, %cst_34 [1] : vector<16x32xf32> to vector<16xf32>
    %114 = vector.shape_cast %113 : vector<16xf32> to vector<16x1xf32>
    %cst_35 = arith.constant 3.200000e+01 : f32
    %115 = vector.broadcast %cst_35 : f32 to vector<16x1xf32>
    %116 = arith.divf %114, %115 : vector<16x1xf32>
    %117 = vector.broadcast %109 : vector<16x1xf32> to vector<16x32xf32>
    %118 = arith.subf %105, %117 : vector<16x32xf32>
    %cst_36 = arith.constant 9.99999996E-13 : f32
    %119 = vector.broadcast %cst_36 : f32 to vector<16x1xf32>
    %120 = arith.addf %116, %119 : vector<16x1xf32>
    %121 = math.rsqrt %120 : vector<16x1xf32>
    %122 = vector.broadcast %121 : vector<16x1xf32> to vector<16x32xf32>
    %123 = arith.mulf %118, %122 : vector<16x32xf32>
    %124 = vector.broadcast %4 : vector<1x32xf32> to vector<16x32xf32>
    %125 = arith.mulf %123, %124 : vector<16x32xf32>
    %126 = vector.broadcast %5 : vector<1x32xf32> to vector<16x32xf32>
    %127 = arith.addf %125, %126 : vector<16x32xf32>
    %c0_37 = arith.constant 0 : index
    %c0_38 = arith.constant 0 : index
    %c0_39 = arith.constant 0 : index
    %128 = vector.load %arg7[%c0_37, %c0_38, %c0_39] : memref<1x32x64xbf16, #tpu.memory_space<vmem>>, vector<1x32x64xbf16>
    %129 = vector.shape_cast %128 : vector<1x32x64xbf16> to vector<32x64xbf16>
    %130 = arith.truncf %127 : vector<16x32xf32> to vector<16x32xbf16>
    %cst_40 = arith.constant dense<0.000000e+00> : vector<16x64xf32>
    %131 = tpu.matmul %130, %129, %cst_40 {dimension_numbers = #tpu.dot_dimension_numbers<[1], [0], [0], [1], [0, 0, 1, 1], [], []>} : vector<16x32xbf16>, vector<32x64xbf16>, vector<16x64xf32> -> vector<16x64xf32>
    %132 = vector.broadcast %6 : vector<1x64xf32> to vector<16x64xf32>
    %133 = arith.addf %131, %132 : vector<16x64xf32>
    %cst_41 = arith.constant 5.000000e-01 : f32
    %134 = vector.broadcast %cst_41 : f32 to vector<16x64xf32>
    %135 = arith.mulf %134, %133 : vector<16x64xf32>
    %cst_42 = arith.constant 4.471500e-02 : f32
    %136 = vector.broadcast %cst_42 : f32 to vector<16x64xf32>
    %137 = arith.mulf %136, %133 : vector<16x64xf32>
    %138 = arith.mulf %137, %133 : vector<16x64xf32>
    %139 = arith.mulf %138, %133 : vector<16x64xf32>
    %140 = arith.addf %133, %139 : vector<16x64xf32>
    %cst_43 = arith.constant 0.797884583 : f32
    %141 = vector.broadcast %cst_43 : f32 to vector<16x64xf32>
    %142 = arith.mulf %141, %140 : vector<16x64xf32>
    %143 = math.tanh %142 : vector<16x64xf32>
    %cst_44 = arith.constant 1.000000e+00 : f32
    %144 = vector.broadcast %cst_44 : f32 to vector<16x64xf32>
    %145 = arith.addf %144, %143 : vector<16x64xf32>
    %146 = arith.mulf %135, %145 : vector<16x64xf32>
    %c0_45 = arith.constant 0 : index
    %c0_46 = arith.constant 0 : index
    %c0_47 = arith.constant 0 : index
    %147 = vector.load %arg8[%c0_45, %c0_46, %c0_47] : memref<1x64x32xbf16, #tpu.memory_space<vmem>>, vector<1x64x32xbf16>
    %148 = vector.shape_cast %147 : vector<1x64x32xbf16> to vector<64x32xbf16>
    %149 = arith.truncf %146 : vector<16x64xf32> to vector<16x64xbf16>
    %cst_48 = arith.constant dense<0.000000e+00> : vector<16x32xf32>
    %150 = tpu.matmul %149, %148, %cst_48 {dimension_numbers = #tpu.dot_dimension_numbers<[1], [0], [0], [1], [0, 0, 1, 1], [], []>} : vector<16x64xbf16>, vector<64x32xbf16>, vector<16x32xf32> -> vector<16x32xf32>
    %151 = vector.broadcast %7 : vector<1x32xf32> to vector<16x32xf32>
    %152 = arith.addf %150, %151 : vector<16x32xf32>
    %153 = arith.addf %152, %127 : vector<16x32xf32>
    %cst_49 = arith.constant dense<0.000000e+00> : vector<16xf32>
    %154 = vector.multi_reduction <add>, %153, %cst_49 [1] : vector<16x32xf32> to vector<16xf32>
    %155 = vector.shape_cast %154 : vector<16xf32> to vector<16x1xf32>
    %cst_50 = arith.constant 3.200000e+01 : f32
    %156 = vector.broadcast %cst_50 : f32 to vector<16x1xf32>
    %157 = arith.divf %155, %156 : vector<16x1xf32>
    %158 = vector.broadcast %157 : vector<16x1xf32> to vector<16x32xf32>
    %159 = arith.subf %153, %158 : vector<16x32xf32>
    %160 = arith.mulf %159, %159 : vector<16x32xf32>
    %cst_51 = arith.constant dense<0.000000e+00> : vector<16xf32>
    %161 = vector.multi_reduction <add>, %160, %cst_51 [1] : vector<16x32xf32> to vector<16xf32>
    %162 = vector.shape_cast %161 : vector<16xf32> to vector<16x1xf32>
    %cst_52 = arith.constant 3.200000e+01 : f32
    %163 = vector.broadcast %cst_52 : f32 to vector<16x1xf32>
    %164 = arith.divf %162, %163 : vector<16x1xf32>
    %165 = vector.broadcast %157 : vector<16x1xf32> to vector<16x32xf32>
    %166 = arith.subf %153, %165 : vector<16x32xf32>
    %cst_53 = arith.constant 9.99999996E-13 : f32
    %167 = vector.broadcast %cst_53 : f32 to vector<16x1xf32>
    %168 = arith.addf %164, %167 : vector<16x1xf32>
    %169 = math.rsqrt %168 : vector<16x1xf32>
    %170 = vector.broadcast %169 : vector<16x1xf32> to vector<16x32xf32>
    %171 = arith.mulf %166, %170 : vector<16x32xf32>
    %172 = vector.broadcast %8 : vector<1x32xf32> to vector<16x32xf32>
    %173 = arith.mulf %171, %172 : vector<16x32xf32>
    %174 = vector.broadcast %9 : vector<1x32xf32> to vector<16x32xf32>
    %175 = arith.addf %173, %174 : vector<16x32xf32>
    %c0_54 = arith.constant 0 : index
    %c0_55 = arith.constant 0 : index
    %176 = vector.load %arg12[%c0_54, %c0_55] : memref<16x32xf32, #tpu.memory_space<vmem>>, vector<16x32xf32>
    tpu.vector_store %arg12[%c0_54, %c0_55], %175 {strides = array<i32>} : memref<16x32xf32, #tpu.memory_space<vmem>>, vector<16x32xf32>,
    %c1_i32 = arith.constant 1 : i32
    %177 = arith.cmpi eq, %arg1, %c1_i32 : i32
    %178 = arith.extui %177 : i1 to i32
    %c0_i32_56 = arith.constant 0 : i32
    %179 = arith.cmpi ne, %178, %c0_i32_56 : i32
    scf.if %179 {
      %c0_57 = arith.constant 0 : index
      %c0_58 = arith.constant 0 : index
      %180 = vector.load %arg9[%c0_57, %c0_58] : memref<32x128xbf16, #tpu.memory_space<vmem>>, vector<32x128xbf16>
      %181 = arith.truncf %175 : vector<16x32xf32> to vector<16x32xbf16>
      %cst_59 = arith.constant dense<0.000000e+00> : vector<16x128xf32>
      %182 = tpu.matmul %181, %180, %cst_59 {dimension_numbers = #tpu.dot_dimension_numbers<[1], [0], [0], [1], [0, 0, 1, 1], [], []>} : vector<16x32xbf16>, vector<32x128xbf16>, vector<16x128xf32> -> vector<16x128xf32>
      %c2 = arith.constant 2 : index
      %c0_60 = arith.constant 0 : index
      %183 = vector.load %arg4[%c2, %c0_60] : memref<8x128xf32, #tpu.memory_space<vmem>>, vector<1x128xf32>
      %184 = vector.broadcast %183 : vector<1x128xf32> to vector<16x128xf32>
      %185 = arith.addf %182, %184 : vector<16x128xf32>
      %c0_61 = arith.constant 0 : index
      %c0_62 = arith.constant 0 : index
      %186 = vector.load %arg11[%c0_61, %c0_62] : memref<16x128xf32, #tpu.memory_space<vmem>>, vector<16x128xf32>
      tpu.vector_store %arg11[%c0_61, %c0_62], %185 {strides = array<i32>} : memref<16x128xf32, #tpu.memory_space<vmem>>, vector<16x128xf32>,
    } else {
    }
    return
  }
  func.func @transform_0(%arg0: i32, %arg1: i32) -> (i32, i32) {
    %c0_i32 = arith.constant 0 : i32
    %c0_i32_0 = arith.constant 0 : i32
    return %arg0, %c0_i32 : i32, i32
  }
  func.func @transform_1(%arg0: i32, %arg1: i32) -> (i32, i32, i32) {
    %c0_i32 = arith.constant 0 : i32
    %c0_i32_0 = arith.constant 0 : i32
    %c0_i32_1 = arith.constant 0 : i32
    return %arg0, %c0_i32, %c0_i32_0 : i32, i32, i32
  }
  func.func @transform_2(%arg0: i32, %arg1: i32) -> (i32, i32) {
    %c0_i32 = arith.constant 0 : i32
    %c0_i32_0 = arith.constant 0 : i32
    %c0_i32_1 = arith.constant 0 : i32
    return %c0_i32, %c0_i32_0 : i32, i32
  }
  func.func @transform_3(%arg0: i32, %arg1: i32) -> (i32, i32, i32) {
    %c0_i32 = arith.constant 0 : i32
    %c0_i32_0 = arith.constant 0 : i32
    %c0_i32_1 = arith.constant 0 : i32
    return %arg1, %c0_i32, %c0_i32_0 : i32, i32, i32
  }
  func.func @transform_4(%arg0: i32, %arg1: i32) -> (i32, i32, i32) {
    %c0_i32 = arith.constant 0 : i32
    %c0_i32_0 = arith.constant 0 : i32
    %c0_i32_1 = arith.constant 0 : i32
    return %arg1, %c0_i32, %c0_i32_0 : i32, i32, i32
  }
  func.func @transform_5(%arg0: i32, %arg1: i32) -> (i32, i32, i32) {
    %c0_i32 = arith.constant 0 : i32
    %c0_i32_0 = arith.constant 0 : i32
    %c0_i32_1 = arith.constant 0 : i32
    return %arg1, %c0_i32, %c0_i32_0 : i32, i32, i32
  }
  func.func @transform_6(%arg0: i32, %arg1: i32) -> (i32, i32, i32) {
    %c0_i32 = arith.constant 0 : i32
    %c0_i32_0 = arith.constant 0 : i32
    %c0_i32_1 = arith.constant 0 : i32
    return %arg1, %c0_i32, %c0_i32_0 : i32, i32, i32
  }
  func.func @transform_7(%arg0: i32, %arg1: i32) -> (i32, i32) {
    %c0_i32 = arith.constant 0 : i32
    %c0_i32_0 = arith.constant 0 : i32
    %c0_i32_1 = arith.constant 0 : i32
    return %c0_i32, %c0_i32_0 : i32, i32
  }
  func.func @transform_8(%arg0: i32, %arg1: i32) -> (i32, i32, i32) {
    %c0_i32 = arith.constant 0 : i32
    %c0_i32_0 = arith.constant 0 : i32
    %c0_i32_1 = arith.constant 0 : i32
    return %arg1, %c0_i32, %c0_i32_0 : i32, i32, i32
  }
  func.func @transform_9(%arg0: i32, %arg1: i32) -> (i32, i32) {
    %c0_i32 = arith.constant 0 : i32
    %c0_i32_0 = arith.constant 0 : i32
    return %arg0, %c0_i32 : i32, i32
  }
}

</mosaic_0001>

<bundles_post_ra>
// kernel: tpu_custom_call.1
= control target key start
LH: loop header
LB: loop body
LE: loop exit
PB: predicated region body
PF: predicated region fallthrough
CT: control target
= control target key end

     0   :  { %s2740_s0 = inlined_call_operand.hbm [shape: f32[16,32], index: 0, kind: input, shape index: {}]   ;;  %s2741_s1 = inlined_call_operand.hbm [shape: f32[1,16,16], index: 1, kind: input, shape index: {}]   ;;  %s2742_s2 = inlined_call_operand.hbm [shape: f32[8,128], index: 2, kind: input, shape index: {}]   ;;  %s2743_s3 = inlined_call_operand.vmem [shape: bf16[2,32,96], index: 3, kind: input, shape index: {}]   ;;  %s2744_s4 = inlined_call_operand.vmem [shape: bf16[2,32,32], index: 4, kind: input, shape index: {}]   ;;  %s2745_s5 = inlined_call_operand.vmem [shape: bf16[2,32,64], index: 5, kind: input, shape index: {}]   ;;  %s2746_s6 = inlined_call_operand.vmem [shape: bf16[2,64,32], index: 6, kind: input, shape index: {}]   ;;  %s2747_s7 = inlined_call_operand.vmem [shape: bf16[32,128], index: 7, kind: input, shape index: {}]   ;;  %s2748_s8 = inlined_call_operand.hbm [shape: f32[2,8,96], index: 8, kind: input, shape index: {}]   ;;  %s2749_s9 = inlined_call_operand.hbm [shape: f32[16,128], index: 9, kind: output, shape index: {}]  }
   0x1   :  { %2757 = sst [smem:[#allocation16_spill]] %s2745_s5 }
   0x2   :  { %2758 = sst [smem:[#allocation17_spill]] %s2746_s6 }
   0x3   :  { %2759 = sst [smem:[#allocation18_spill]] %s2747_s7 }
   0x4   :  { %2760 = sst [smem:[#allocation19_spill]] %s2749_s9 }
   0x5   :  { %14 = vsyncpa [#allocation4], 0 }
   0x6   :  { %15 = vsyncpa [#allocation7], 0 }
   0x7   :  { %16 = vsyncpa [#allocation10], 0 }
   0x8   :  { %18 = vsyncpa [#allocation10 + $0x1], 0 }
   0x9   :  { %19 = vsyncpa [#allocation5], 0  ;;  %s2330_s30 = smov 0   ;;  %s2332_s10 = smov 0  }
   0xa   :  { %s2334_s11 = smov 0   ;;  %s2336_s12 = smov 0  }
   0xb   :  { %s2338_s13 = smov 0   ;;  %s2340_s14 = smov 0  }
   0xc LB: > { %s2754_s15 = sadd.s32 4294967295, %s2252_s14   ;;  %p255_p0 = scmp.ne.s32.totalorder %s2236_s10, %s2232_s30  ;;  %s2252_s14 = sphi %s2340_s14, %s25_s14   ;;  %s2248_s13 = sphi %s2338_s13, %s2780_s13   ;;  %s2244_s12 = sphi %s2336_s12, %s2779_s12   ;;  %s2240_s11 = sphi %s2334_s11, %s2778_s11   ;;  %s2236_s10 = sphi %s2332_s10, %s2777_s10   ;;  %s2232_s30 = sphi %s2330_s30, %s2776_s30  }
   0xd   : > { %p2362_p1 = scmp.eq.s32.totalorder %s2754_s15, 0  ;;  %p1678_p2 = scmp.ge.s32.totalorder %s2252_s14, 1 }
   0xe   : > { %p292_p3 = scmp.lt.s32.totalorder %s2252_s14, 3  ;;  %s2254_s19 = smov [#allocation6]  }
   0xf   : > { %s2761_s16 = scalar_select %p2362_p1, 1, 0 }
  0x10   : > { %p2370_p4 = por %p2362_p1, %p255_p0  ;;  %p2374_p5 = pnand %p1678_p2, %p292_p3 }
  0x11   : > { %s323_s20 = sshll.u32 %s2254_s19, 4  ;;  %s2255_s22 = smov [#allocation3]   ;;  %s324_s20 = int_to_ptr.vmem [resolvable:$true] %s323_s20 }
  0x12   : > { %s2762_s17 = scalar_select %p2370_p4, 1, 0 }
  0x13   : > { %s2763_s18 = scalar_select %p2374_p5, 1, 0 }
  0x14   : > { %p1879_p6 = pneg %p2374_p5  ;;  %s307_s23 = sshll.u32 %s2255_s22, 4  ;;  %s308_s23 = int_to_ptr.vmem [resolvable:$true] %s307_s23 }
  0x15   : > { %s2050_s26 = scalar_lea.hbm %s2741_s1, 256 }
  0x16   : > { %p2382_p7 = pnand %p1879_p6, %p2362_p1  ;;  %p2051_p8 = scmp.ne.s32.totalorder %s2741_s1, %s2050_s26 }
  0x17   : > { %p2057_p12 = scmp.lt.u32.totalorder %s2050_s26, %s2741_s1 }
  0x18   : > { %p2394_p9 = pneg %p2382_p7 }
  0x1a   : > { %p2053_p10 = pnand %p2394_p9, %p2051_p8 }
  0x1c   : > { %p2054_p11 = pneg %p2053_p10 }
  0x1e   : > { %p2059_p13 = pnand %p2057_p12, %p2054_p11 }
  0x20   : > { %2062 = shalt.err (!%p2059_p13)
}
  0x21   : > { %s2063_s22 = scalar_lea.vmem %s324_s20, 256  ;;  %p2071_p6 = scmp.lt.s32.totalorder %s324_s20, %s324_s20 }
  0x22   : > { %p2064_p0 = scmp.ne.s32.totalorder %s324_s20, %s2063_s22  ;;  %p2072_p4 = scmp.lt.s32.totalorder %s2063_s22, %s2063_s22 }
  0x24   : > { %p2066_p2 = pnand %p2064_p0, %p2394_p9  ;;  %p2073_p1 = por %p2072_p4, %p2071_p6 }
  0x26   : > { %p2067_p3 = pneg %p2066_p2 }
  0x28   : > { %p2074_p5 = pnand %p2073_p1, %p2067_p3 }
  0x2a   : > { %2077 = shalt.err (!%p2074_p5)
}
  0x2b   : > { %s2256_s24 = smov 128   ;;  %s2257_s25 = smov 8  }
  0x2c   : > { %1885 = dma.hbm_to_vmem [thread:$0]  (!%p2382_p7), %s2741_s1, 256, %s324_s20, [#allocation7], %s2256_s24, %s2256_s24, %s2257_s25  }
  0x2d   : > { %s2258_s28 = smov [#allocation8]   ;;  %s2078_s9 = scalar_lea.hbm %s2740_s0, 256 }
  0x2e   : > { %s337_s30 = sshll.u32 %s2258_s28, 4  ;;  %p2079_p1 = scmp.ne.s32.totalorder %s2740_s0, %s2078_s9  ;;  %s338_s30 = int_to_ptr.vmem [resolvable:$true] %s337_s30 }
  0x2f   : > { %p2085_p8 = scmp.lt.u32.totalorder %s2078_s9, %s2740_s0 }
  0x30   : > { %p2081_p4 = pnand %p2079_p1, %p2394_p9 }
  0x32   : > { %p2082_p5 = pneg %p2081_p4 }
  0x34   : > { %p2087_p10 = pnand %p2085_p8, %p2082_p5 }
  0x36   : > { %2090 = shalt.err (!%p2087_p10)
}
  0x37   : > { %s2091_s20 = scalar_lea.vmem %s308_s23, 256  ;;  %p2099_p0 = scmp.lt.s32.totalorder %s308_s23, %s308_s23 }
  0x38   : > { %p2092_p11 = scmp.ne.s32.totalorder %s308_s23, %s2091_s20  ;;  %p2100_p2 = scmp.lt.s32.totalorder %s2091_s20, %s2091_s20 }
  0x3a   : > { %p2094_p12 = pnand %p2092_p11, %p2394_p9  ;;  %p2101_p3 = por %p2100_p2, %p2099_p0 }
  0x3c   : > { %p2095_p13 = pneg %p2094_p12 }
  0x3e   : > { %p2102_p6 = pnand %p2101_p3, %p2095_p13 }
  0x40   : > { %2105 = shalt.err (!%p2102_p6)
}
  0x41   : > { %1882 = dma.hbm_to_vmem [thread:$0]  (!%p2382_p7), %s2740_s0, 256, %s308_s23, [#allocation4], %s2256_s24, %s2256_s24, %s2257_s25  }
  0x42   : > { %s2106_s9 = scalar_lea.hbm %s2742_s2, 128 }
  0x43   : > { %p2107_p1 = scmp.ne.s32.totalorder %s2742_s2, %s2106_s9  ;;  %p2113_p8 = scmp.lt.u32.totalorder %s2106_s9, %s2742_s2 }
  0x45   : > { %p2109_p4 = pnand %p2107_p1, %p2394_p9 }
  0x47   : > { %p2110_p5 = pneg %p2109_p4 }
  0x49   : > { %p2115_p10 = pnand %p2113_p8, %p2110_p5 }
  0x4b   : > { %2118 = shalt.err (!%p2115_p10)
}
  0x4c   : > { %s2119_s22 = scalar_lea.vmem %s338_s30, 128  ;;  %p2127_p0 = scmp.lt.s32.totalorder %s338_s30, %s338_s30 }
  0x4d   : > { %p2120_p11 = scmp.ne.s32.totalorder %s338_s30, %s2119_s22  ;;  %p2128_p2 = scmp.lt.s32.totalorder %s2119_s22, %s2119_s22 }
  0x4f   : > { %p2122_p12 = pnand %p2120_p11, %p2394_p9  ;;  %p2129_p3 = por %p2128_p2, %p2127_p0 }
  0x51   : > { %p2123_p13 = pneg %p2122_p12 }
  0x53   : > { %p2130_p6 = pnand %p2129_p3, %p2123_p13 }
  0x55   : > { %2133 = shalt.err (!%p2130_p6)
}
  0x56   : > { %1888 = dma.hbm_to_vmem [thread:$0]  (!%p2382_p7), %s2742_s2, 128, %s338_s30, [#allocation7]  }
  0x57   : > { %s34_s29 = sadd.s32 1, %s2248_s13  ;;  %p249_p9 = scmp.ne.s32.totalorder %s2240_s11, %s2236_s10 }
  0x58   : > { %p35_p1 = scmp.ge.s32.totalorder %s34_s29, 2  ;;  %p250_p4 = scmp.eq.s32.totalorder %s2252_s14, 0 }
  0x59   : > { %s242_s25 = sadd.s32 1, %s2240_s11  ;;  %s383_s21 = sand.u32 1, %s2240_s11  }
  0x5a   : > { %s2782_s29 = smov (%p35_p1, %s34_s29), 0  ;;  %p251_p5 = por %p250_p4, %p249_p9 }
  0x5b   : > { %p1896_p8 = scmp.lt.s32.totalorder %s2252_s14, 2  ;;  %s239_s20 = ssub.s32 %s2248_s13, %s2782_s29 }
  0x5c   : > { %s1683_s7 = sshll.u32 %s383_s21, 3  ;;  %p240_p10 = scmp.eq.s32.totalorder %s239_s20, 0 }
  0x5d   : > { %s1684_s15 = sshll.u32 %s2248_s13, 7  ;;  %s387_s5 = scalar_lea.vmem [#allocation9], %s1683_s7 }
  0x5e   : > { %s394_s6 = sshll.u32 %s387_s5, 4  ;;  %s2464_s26 = scalar_lea.hbm %s2748_s8, %s1684_s15  ;;  %s2466_s6 = int_to_ptr.vmem [resolvable:$true] %s394_s6 }
  0x5f   : > { %s2459_s9 = scalar_select %p240_p10, %s2240_s11, %s242_s25  }
  0x60   : > { %p2468_p7 = pnand %p1896_p8, %p251_p5  ;;  %s384_s19 = scalar_lea.sflag [#allocation10], %s383_s21 }
  0x61   : > { %s2134_s22 = scalar_lea.hbm %s2464_s26, 128  ;;  %s2139_s25 = scalar_lea.hbm %s2748_s8, 256 }
  0x62   : > { %p2135_p11 = scmp.ne.s32.totalorder %s2464_s26, %s2134_s22  ;;  %p2136_p12 = pneg %p2468_p7 }
  0x63   : > { %p2140_p2 = scmp.lt.u32.totalorder %s2464_s26, %s2748_s8  ;;  %p2141_p3 = scmp.lt.u32.totalorder %s2139_s25, %s2134_s22 }
  0x64   : > { %p2137_p13 = pnand %p2136_p12, %p2135_p11  ;;  %p2143_p9 = scmp.lt.u32.totalorder %s2134_s22, %s2464_s26 }
  0x65   : > { %p2142_p6 = por %p2141_p3, %p2140_p2 }
  0x66   : > { %p2138_p0 = pneg %p2137_p13 }
  0x67   : > { %p2144_p1 = por %p2143_p9, %p2142_p6 }
  0x69   : > { %p2145_p4 = pnand %p2144_p1, %p2138_p0 }
  0x6b   : > { %2148 = shalt.err (!%p2145_p4)
}
  0x6c   : > { %s2149_s21 = scalar_lea.vmem %s2466_s6, 128  ;;  %s2259_s15 = smov [#allocation9]  }
  0x6d   : > { %p2150_p5 = scmp.ne.s32.totalorder %s2466_s6, %s2149_s21  ;;  %s2154_s5 = sshll.u32 %s2259_s15, 4  ;;  %s2155_s5 = int_to_ptr.vmem [resolvable:$false] %s2154_s5 }
  0x6e   : > { %s2156_s30 = scalar_lea.vmem %s2155_s5, 256  ;;  %p2157_p11 = scmp.lt.s32.totalorder %s2466_s6, %s2155_s5 }
  0x6f   : > { %p2152_p8 = pnand %p2150_p5, %p2136_p12  ;;  %p2158_p13 = scmp.lt.s32.totalorder %s2156_s30, %s2149_s21 }
  0x71   : > { %p2153_p10 = pneg %p2152_p8  ;;  %p2159_p2 = por %p2158_p13, %p2157_p11 }
  0x73   : > { %p2160_p3 = pnand %p2159_p2, %p2153_p10 }
  0x75   : > { %2163 = shalt.err (!%p2160_p3)
}
  0x76   : > { %1892 = dma.hbm_to_vmem [thread:$0]  (!%p2468_p7), %s2464_s26, 128, %s2466_s6, %s384_s19  }
  0x77   : > { %p2767_p0 = scmp.ne.s32.totalorder %s2763_s18, 0 }
  0x78   : > { %p2768_p12 = scmp.ne.s32.totalorder (!%p2767_p0), %s2761_s16, 0 }
  0x79   : > { %403 = sbr.rel (%p2767_p0) target bundleno = 3304 (0xce8), region = 56 }
  0x80   : > { %2215 = dma.done.wait (%p2768_p12), [#allocation4], 256  }
  0x81   : > { %2217 = vsyncadd (%p2768_p12), [#allocation4], 4294967040 }
  0x82   : > { %2219 = dma.done.wait (%p2768_p12), [#allocation7], 384  }
  0x83   : > { %2221 = vsyncadd (%p2768_p12), [#allocation7], 4294966912  ;;  %s417_s27 = sand.u32 1, %s2236_s10   ;;  %p2769_p7 = scmp.ne.s32.totalorder %s2762_s17, 0 }
  0x84   : > { %s1689_s28 = sshll.u32 %s417_s27, 3  ;;  %s418_s6 = scalar_lea.sflag [#allocation10], %s417_s27 }
  0x85   : > { %s421_s26 = scalar_lea.vmem [#allocation9], %s1689_s28 }
  0x86   : > { %2223 = dma.done.wait (%p2769_p7), %s418_s6, 128  }
  0x87   : > { %2225 = vsyncadd (%p2769_p7), %s418_s6, 4294967168  ;;  %p472_p6 = scmp.lt.s32.totalorder %s2244_s12, 1  ;;  %s2770_s17 = sld [smem:[#allocation16_spill]]  ;;  %v2534_v0 = vld [vmem:[%s421_s26] sm:$0xff] }
  0x88   : > { %s2771_s28 = sld [smem:[#allocation17_spill]]  ;;  %p1698_p9 = scmp.ne.s32.totalorder %s2244_s12, 0 }
  0x89   : > { %s473_s18 = scalar_select %p472_p6, %s2244_s12, 1 }
  0x8a   : > { %498 = sbr.rel (%p1698_p9) target bundleno = 457 (0x1c9), region = 76  ;;  %v499_v1 = vld [vmem:[#allocation3] sm:$0xff] (!%p1698_p9)  ;;  %vm503_vm0 = vcmask (!%p1698_p9), 261120   ;;  %v500_v2 = vld [vmem:[#allocation3 + $0x8] sm:$0xff] (!%p1698_p9) }
  0x8b   : > { %s1732_s19 = sshll.u32 %s473_s18, 4  ;;  %s1735_s22 = sshll.u32 %s473_s18, 5  ;;  %v504_v3 = vsel (!%p1698_p9), %vm503_vm0, %v499_v1, 0.0  ;;  %v507_v4 = vsel (!%p1698_p9), %vm503_vm0, %v500_v2, 0.0  ;;  %v1699_v22 = vld [vmem:[#allocation8] ss:$0 sm:$0xff] (!%p1698_p9) }
  0x8c   : > { %s2517_s24 = scalar_lea.vmem %s2743_s3, %s1732_s19  ;;  %s2522_s7 = scalar_lea.vmem %s2744_s4, %s1732_s19  ;;  %505 = vadd.xlane.f32.xlu0 (!%p1698_p9), %v504_v3  ;;  %v1700_v24 = vld [vmem:[#allocation8 + $0x1] ss:$0 sm:$0xff] (!%p1698_p9) }
  0x8d   : > { %s2527_s5 = scalar_lea.vmem %s2770_s17, %s1732_s19 }
  0x8e   : > { %s2532_s6 = scalar_lea.vmem %s2771_s28, %s1735_s22 }
  0x90   : > { %508 = vadd.xlane.f32.xlu0 (!%p1698_p9), %v507_v4 }
 0x119   : > { %v506_v5 = vpop.xlane.xlu0 %505 }
 0x11a   : > { %v511_v6 = vmul.f32 0.03125, %v506_v5 }
 0x11c   : > { %v513_v7 = vsub.f32 %v499_v1, %v511_v6 }
 0x11d   : > { %v509_v8 = vpop.xlane.xlu0 %508 }
 0x11e   : > { %v512_v9 = vmul.f32 0.03125, %v509_v8  ;;  %v515_v10 = vmul.f32 %v513_v7, %v513_v7 }
 0x120   : > { %v514_v11 = vsub.f32 %v500_v2, %v512_v9  ;;  %v517_v12 = vsel %vm503_vm0, %v515_v10, 0.0 }
 0x121   : > { %518 = vadd.xlane.f32.xlu1 %v517_v12 }
 0x122   : > { %v516_v13 = vmul.f32 %v514_v11, %v514_v11 }
 0x124   : > { %v520_v14 = vsel %vm503_vm0, %v516_v13, 0.0 }
 0x125   : > { %521 = vadd.xlane.f32.xlu1 %v520_v14 }
 0x1ae   : > { %v519_v15 = vpop.xlane.xlu1 %518 }
 0x1af   : > { %v523_v16 = vmul.f32 0.03125, %v519_v15 }
 0x1b1   : > { %v525_v17 = vadd.f32 1e-12, %v523_v16 }
 0x1b2   : > { %v522_v18 = vpop.xlane.xlu1 %521 }
 0x1b3   : > { %1975 = vrsqrt.f32 %v525_v17  ;;  %v524_v19 = vmul.f32 0.03125, %v522_v18 }
 0x1b5   : > { %v526_v20 = vadd.f32 1e-12, %v524_v19 }
 0x1b7   : > { %1977 = vrsqrt.f32 %v526_v20 }
 0x1bd   : > { %v1976_v21 = vpop.eup %1975 }
 0x1be   : > { %v529_v23 = vmul.f32 %v1976_v21, %v513_v7 }
 0x1c0   : > { %v535_v25 = vmul.f32 %v1699_v22, %v529_v23 }
 0x1c1   : > { %v1978_v26 = vpop.eup %1977 }
 0x1c2   : > { %v541_v27 = vadd.f32 %v1700_v24, %v535_v25  ;;  %v530_v28 = vmul.f32 %v1978_v26, %v514_v11 }
 0x1c4   : > { %543 = vst.msk [vmem:[#allocation2] sm:$0xff] %vm503_vm0, %v541_v27  ;;  %v536_v29 = vmul.f32 %v1699_v22, %v530_v28 }
 0x1c6   : > { %v542_v30 = vadd.f32 %v1700_v24, %v536_v29 }
 0x1c8   : > { %544 = vst.msk [vmem:[#allocation2 + $0x8] sm:$0xff] %vm503_vm0, %v542_v30 }
 0x1c9 PF: > { %v1994_v31 = vld [vmem:[%s2517_s24] sm:$0xff]   ;;  %v2260_v32 = vmov 0.0   ;;  %v1995_v33 = vld [vmem:[%s2517_s24 + $0x8] sm:$0xff]   ;;  %vm2261_vm1 = vmmov 0   ;;  %vm568_vm2 = vcmask 261120   ;;  %v552_v37 = vlaneseq  ;;  %s2262_s26 = smov 96  }
 0x1ca   : > { %1769 = vmatprep.subr.bf16.mxu0 %v2260_v32  ;;  %1777 = vmatprep.subr.bf16.mxu1 %v2260_v32  ;;  %s2263_s18 = smov 120   ;;  %s2264_s19 = smov 88   ;;  %vm622_vm3 = vcmask 64512   ;;  %v617_v62 = vld [vmem:[#allocation6] sm:$0xff]  ;;  %v618_v1 = vld [vmem:[#allocation6 + $0x8] sm:$0xff]  ;;  %vm670_vm4 = vcmask 130048  }
 0x1cb   : > { %1770 = vmatpush3.bf16.msra.mxu0 %v1994_v31  ;;  %1773 = vmatprep.mubr.msk.bf16.mxu0 %vm2261_vm1, %v2260_v32  ;;  %v2549_v34 = vld [vmem:[#allocation2] sm:$0xff]  ;;  %v2562_v38 = vshrl.u32 %v552_v37, 7  ;;  %s2265_s22 = smov 80   ;;  %s2266_s23 = smov 112   ;;  %vm1133_vm5 = vcmask 195584   ;;  %vm1362_vm6 = vcmask 523264  }
 0x1cc   : > { %1771 = vmatprep.subr.bf16.mxu0 %v2260_v32  ;;  %1779 = vmatprep.mubr.msk.bf16.mxu1 %vm2261_vm1, %v2260_v32  ;;  %s2267_s16 = smov 72   ;;  %s2268_s24 = smov 104  }
 0x1cd   : > { %v554_v39 = vsub.s32 0, %v2562_v38  ;;  %s2269_s25 = smov 56   ;;  %s2270_s20 = smov 64  }
 0x1ce   : > { %s2271_s21 = smov 48   ;;  %s2272_s15 = smov 40  }
 0x1cf   : > { %v2551_v35 = vld [vmem:[#allocation2 + $0x8] sm:$0xff]  ;;  %1772 = vmatpush3.bf16.msra.mxu0 %v1995_v33  ;;  %v555_v40 = vrot.slane %v2534_v0, %v554_v39  ;;  %s2273_s17 = smov 8   ;;  %s2274_s30 = smov 16  }
 0x1d0   : > { %v551_v36 = vpack.c.bf16 %v2551_v35, %v2549_v34  ;;  %1783 = vmatprep.subr.bf16.mxu0 %v2260_v32  ;;  %s2275_s27 = smov 24   ;;  %p1723_p1 = scmp.ne.s32.totalorder %s2244_s12, 1 }
 0x1d1   : > { %s2772_s28 = sld [smem:[#allocation18_spill]] (!%p1723_p1)  ;;  %vm2277_vm7 = vmmov (!%p1723_p1), 0  }
 0x1d2   : > { %1774 = vmatmul.mubr.msk.bf16.vlgmr.msra.gmra.mrb[0].mxu0 %vm568_vm2, %v551_v36 }
 0x1d3   : > { %1785 = vmatprep.mubr.msk.bf16.mxu0 %vm2261_vm1, %v2260_v32 }
 0x2a5   : > { %v606_v41 = vpop.f32.mrb[0].mxu0 }
 0x2a6   : > { %v607_v42 = vadd.f32 %v606_v41, %v555_v40  ;;  %v1775_v43 = vpop.f32.mrb[1].mxu0 }
 0x2a7   : > { %v609_v44 = vpop.f32.mrb[2].mxu0 }
 0x2a8   : > { %v610_v45 = vadd.f32 %v609_v44, %v555_v40  ;;  %v1776_v46 = vpop.f32.mrb[3].mxu0  ;;  %v613_v47 = vmul.f32 0.35355338, %v607_v42 }
 0x2aa   : > { %v614_v48 = vmul.f32 0.35355338, %v610_v45  ;;  %v2566_v49 = vpack.c.bf16 %v610_v45, %v607_v42 }
 0x2ac   : > { %v615_v50 = vpack.c.bf16 %v614_v48, %v613_v47  ;;  %620 = vrot.lane.b32.xlu0 %v2566_v49, %s2262_s26 }
 0x2ae   : > { %742 = vrot.lane.b32.xlu1 %v615_v50, %s2263_s18 }
 0x2b0   : > { %744 = vrot.lane.b32.xlu0 %v2566_v49, %s2264_s19 }
 0x2b2   : > { %865 = vrot.lane.b32.xlu1 %v2566_v49, %s2265_s22 }
 0x2b4   : > { %863 = vrot.lane.b32.xlu0 %v615_v50, %s2266_s23 }
 0x2b6   : > { %986 = vrot.lane.b32.xlu1 %v2566_v49, %s2267_s16 }
 0x2b8   : > { %984 = vrot.lane.b32.xlu0 %v615_v50, %s2268_s24 }
 0x31e   : > { %v621_v51 = vpop.permute.xlu0 %620 }
 0x31f   : > { %v627_v52 = vsel %vm622_vm3, %v621_v51, 0 }
 0x320   : > { %1778 = vmatpush3.bf16.xpose.msra.mxu1 %v627_v52  ;;  %v743_v54 = vpop.permute.xlu1 %742 }
 0x321   : > { %1789 = vmatprep.subr.bf16.mxu1 %v2260_v32 }
 0x322   : > { %v745_v53 = vpop.permute.xlu0 %744 }
 0x323   : > { %v750_v55 = vsel %vm622_vm3, %v745_v53, 0 }
 0x324   : > { %v866_v56 = vpop.permute.xlu1 %865 }
 0x325   : > { %v871_v57 = vsel %vm622_vm3, %v866_v56, 0 }
 0x326   : > { %v864_v59 = vpop.permute.xlu0 %863 }
 0x327   : > { %1780 = vmatmul.mubr.msk.bf16.vlgmr.msra.gmra.mrb[0].mxu1 %vm622_vm3, %v615_v50 }
 0x328   : > { %1790 = vmatpush3.bf16.xpose.msra.mxu1 %v750_v55  ;;  %1791 = vmatprep.mubr.msk.bf16.mxu1 %vm2261_vm1, %v2260_v32  ;;  %v987_v58 = vpop.permute.xlu1 %986 }
 0x329   : > { %1801 = vmatprep.subr.bf16.mxu1 %v2260_v32  ;;  %v992_v60 = vsel %vm622_vm3, %v987_v58, 0 }
 0x32a   : > { %v985_v61 = vpop.permute.xlu0 %984 }
 0x32f   : > { %1792 = vmatmul.mubr.msk.bf16.vlgmr.msra.gmra.mrb[4].mxu1 %vm622_vm3, %v743_v54 }
 0x330   : > { %1802 = vmatpush3.bf16.xpose.msra.mxu1 %v871_v57  ;;  %1803 = vmatprep.mubr.msk.bf16.mxu1 %vm2261_vm1, %v2260_v32 }
 0x331   : > { %1813 = vmatprep.subr.bf16.mxu1 %v2260_v32 }
 0x337   : > { %1804 = vmatmul.mubr.msk.bf16.vlgmr.msra.gmra.mrb[8].mxu1 %vm622_vm3, %v864_v59 }
 0x338   : > { %1814 = vmatpush3.bf16.xpose.msra.mxu1 %v992_v60  ;;  %1815 = vmatprep.mubr.msk.bf16.mxu1 %vm2261_vm1, %v2260_v32 }
 0x339   : > { %1825 = vmatprep.subr.bf16.mxu1 %v2260_v32 }
 0x33f   : > { %1816 = vmatmul.mubr.msk.bf16.vlgmr.msra.gmra.mrb[12].mxu1 %vm622_vm3, %v985_v61 }
 0x340   : > { %1829 = vmatprep.mubr.msk.bf16.mxu1 %vm2261_vm1, %v2260_v32 }
 0x3fa   : > { %v663_v63 = vpop.f32.mrb[0].mxu1 }
 0x3fb   : > { %v664_v2 = vadd.f32 %v663_v63, %v617_v62  ;;  %v1781_v3 = vpop.f32.mrb[1].mxu1 }
 0x3fc   : > { %v666_v4 = vpop.f32.mrb[2].mxu1 }
 0x3fd   : > { %v667_v5 = vadd.f32 %v666_v4, %v618_v1  ;;  %v1782_v6 = vpop.f32.mrb[3].mxu1  ;;  %v671_v7 = vsel %vm670_vm4, %v664_v2, -inf }
 0x3fe   : > { %672 = vmax.xlane.f32.xlu1 %v671_v7 }
 0x3ff   : > { %v674_v8 = vsel %vm670_vm4, %v667_v5, -inf }
 0x400   : > { %675 = vmax.xlane.f32.xlu0 %v674_v8 }
 0x402   : > { %v786_v9 = vpop.f32.mrb[4].mxu1 }
 0x403   : > { %v787_v10 = vadd.f32 %v786_v9, %v617_v62  ;;  %v1793_v11 = vpop.f32.mrb[5].mxu1 }
 0x404   : > { %v789_v12 = vpop.f32.mrb[6].mxu1 }
 0x405   : > { %v790_v13 = vadd.f32 %v789_v12, %v618_v1  ;;  %v1794_v14 = vpop.f32.mrb[7].mxu1  ;;  %v793_v15 = vsel %vm670_vm4, %v787_v10, -inf }
 0x406   : > { %794 = vmax.xlane.f32.xlu0 %v793_v15 }
 0x407   : > { %v796_v16 = vsel %vm670_vm4, %v790_v13, -inf }
 0x408   : > { %797 = vmax.xlane.f32.xlu1 %v796_v16 }
 0x40a   : > { %v907_v17 = vpop.f32.mrb[8].mxu1 }
 0x40b   : > { %v908_v18 = vadd.f32 %v907_v17, %v617_v62  ;;  %v1805_v19 = vpop.f32.mrb[9].mxu1 }
 0x40c   : > { %v910_v20 = vpop.f32.mrb[10].mxu1 }
 0x40d   : > { %v911_v21 = vadd.f32 %v910_v20, %v618_v1  ;;  %v1806_v22 = vpop.f32.mrb[11].mxu1  ;;  %v914_v23 = vsel %vm670_vm4, %v908_v18, -inf }
 0x40e   : > { %915 = vmax.xlane.f32.xlu0 %v914_v23 }
 0x40f   : > { %v917_v24 = vsel %vm670_vm4, %v911_v21, -inf }
 0x410   : > { %918 = vmax.xlane.f32.xlu1 %v917_v24 }
 0x412   : > { %v1028_v25 = vpop.f32.mrb[12].mxu1 }
 0x413   : > { %v1029_v26 = vadd.f32 %v1028_v25, %v617_v62  ;;  %v1817_v27 = vpop.f32.mrb[13].mxu1 }
 0x414   : > { %v1031_v28 = vpop.f32.mrb[14].mxu1 }
 0x415   : > { %v1032_v29 = vadd.f32 %v1031_v28, %v618_v1  ;;  %v1818_v30 = vpop.f32.mrb[15].mxu1  ;;  %v1035_v31 = vsel %vm670_vm4, %v1029_v26, -inf }
 0x416   : > { %1036 = vmax.xlane.f32.xlu0 %v1035_v31 }
 0x417   : > { %v1038_v33 = vsel %vm670_vm4, %v1032_v29, -inf }
 0x418   : > { %1039 = vmax.xlane.f32.xlu1 %v1038_v33 }
 0x48b   : > { %v673_v36 = vpop.xlane.xlu1 %672 }
 0x48c   : > { %v677_v37 = vsub.f32 %v664_v2, %v673_v36 }
 0x48d   : > { %v676_v39 = vpop.xlane.xlu0 %675 }
 0x48e   : > { %v679_v40 = vmul.f32 1.442695, %v677_v37  ;;  %v678_v41 = vsub.f32 %v667_v5, %v676_v39 }
 0x490   : > { %2004 = vpow2.f32 %v679_v40  ;;  %v681_v42 = vmul.f32 1.442695, %v678_v41 }
 0x492   : > { %2006 = vpow2.f32 %v681_v42 }
 0x493   : > { %v795_v43 = vpop.xlane.xlu0 %794 }
 0x494   : > { %v799_v44 = vsub.f32 %v787_v10, %v795_v43 }
 0x495   : > { %v798_v53 = vpop.xlane.xlu1 %797 }
 0x496   : > { %v801_v45 = vmul.f32 1.442695, %v799_v44  ;;  %v800_v54 = vsub.f32 %v790_v13, %v798_v53 }
 0x498   : > { %2008 = vpow2.f32 %v801_v45  ;;  %v803_v57 = vmul.f32 1.442695, %v800_v54 }
 0x49a   : > { %v2005_v46 = vpop.eup %2004  ;;  %2010 = vpow2.f32 %v803_v57 }
 0x49b   : > { %v683_v47 = vsel %vm670_vm4, %v2005_v46, 0.0  ;;  %v916_v56 = vpop.xlane.xlu0 %915 }
 0x49c   : > { %v2007_v48 = vpop.eup %2006  ;;  %684 = vadd.xlane.f32.xlu0 %v683_v47  ;;  %v920_v60 = vsub.f32 %v908_v18, %v916_v56 }
 0x49d   : > { %v686_v50 = vsel %vm670_vm4, %v2007_v48, 0.0  ;;  %v919_v55 = vpop.xlane.xlu1 %918 }
 0x49e   : > { %687 = vadd.xlane.f32.xlu1 %v686_v50  ;;  %v921_v58 = vsub.f32 %v911_v21, %v919_v55  ;;  %v922_v1 = vmul.f32 1.442695, %v920_v60 }
 0x4a0   : > { %v924_v62 = vmul.f32 1.442695, %v921_v58  ;;  %v1996_v58 = vld [vmem:[%s2522_s7] sm:$0xff]  }
 0x4a1   : > { %1826 = vmatpush3.bf16.msra.mxu1 %v1996_v58 }
 0x4a2   : > { %v2602_v51 = vpop.eup %2008  ;;  %2012 = vpow2.f32 %v924_v62  ;;  %1827 = vmatprep.subr.bf16.mxu1 %v2260_v32 }
 0x4a3   : > { %v805_v52 = vsel %vm670_vm4, %v2602_v51, 0.0  ;;  %v1037_v61 = vpop.xlane.xlu0 %1036  ;;  %2014 = vpow2.f32 %v922_v1 }
 0x4a4   : > { %806 = vadd.xlane.f32.xlu0 %v805_v52  ;;  %v1041_v2 = vsub.f32 %v1029_v26, %v1037_v61  ;;  %v2011_v5 = vpop.eup %2010 }
 0x4a5   : > { %v1040_v59 = vpop.xlane.xlu1 %1039  ;;  %v808_v6 = vsel %vm670_vm4, %v2011_v5, 0.0 }
 0x4a6   : > { %v1042_v63 = vsub.f32 %v1032_v29, %v1040_v59  ;;  %v1043_v4 = vmul.f32 1.442695, %v1041_v2 }
 0x4a8   : > { %v1045_v3 = vmul.f32 1.442695, %v1042_v63  ;;  %v1997_v63 = vld [vmem:[%s2522_s7 + $0x8] sm:$0xff]  }
 0x4a9   : > { %1828 = vmatpush3.bf16.msra.mxu1 %v1997_v63 }
 0x4aa   : > { %2016 = vpow2.f32 %v1045_v3  ;;  %1841 = vmatprep.subr.bf16.mxu1 %v2260_v32 }
 0x4ab   : > { %2018 = vpow2.f32 %v1043_v4 }
 0x4ac   : > { %v2013_v7 = vpop.eup %2012 }
 0x4ad   : > { %v2015_v8 = vpop.eup %2014  ;;  %v929_v9 = vsel %vm670_vm4, %v2013_v7, 0.0 }
 0x4ae   : > { %v926_v11 = vsel %vm670_vm4, %v2015_v8, 0.0 }
 0x4af   : > { %816 = vrot.lane.b32.xlu1 %v2566_v49, %s2269_s25 }
 0x4b4   : > { %v2610_v10 = vpop.eup %2016 }
 0x4b5   : > { %v2019_v12 = vpop.eup %2018  ;;  %v1050_v13 = vsel %vm670_vm4, %v2610_v10, 0.0 }
 0x4b6   : > { %v1047_v14 = vsel %vm670_vm4, %v2019_v12, 0.0 }
 0x4ba   : > { %694 = vrot.lane.b32.xlu0 %v2566_v49, %s2270_s20 }
 0x4d3   : > { %809 = vadd.xlane.f32.xlu1 %v808_v6 }
 0x4d7   : > { %930 = vadd.xlane.f32.xlu1 %v929_v9 }
 0x4d9   : > { %927 = vadd.xlane.f32.xlu0 %v926_v11 }
 0x4db   : > { %1051 = vadd.xlane.f32.xlu1 %v1050_v13 }
 0x4dd   : > { %1048 = vadd.xlane.f32.xlu0 %v1047_v14 }
 0x4ec   : > { %937 = vrot.lane.b32.xlu1 %v2566_v49, %s2271_s21 }
 0x4f3   : > { %1058 = vrot.lane.b32.xlu0 %v2566_v49, %s2272_s15 }
 0x529   : > { %v685_v15 = vpop.xlane.xlu0 %684 }
 0x52a   : > { %2020 = vrcp.f32 %v685_v15 }
 0x52b   : > { %v688_v16 = vpop.xlane.xlu1 %687 }
 0x52c   : > { %2022 = vrcp.f32 %v688_v16 }
 0x52f   : > { %v817_v24 = vpop.permute.xlu1 %816 }
 0x531   : > { %v807_v17 = vpop.xlane.xlu0 %806 }
 0x532   : > { %2024 = vrcp.f32 %v807_v17 }
 0x534   : > { %v2021_v18 = vpop.eup %2020 }
 0x535   : > { %v695_v19 = vpop.permute.xlu0 %694  ;;  %v691_v21 = vmul.f32 %v2021_v18, %v2005_v46 }
 0x536   : > { %v2023_v20 = vpop.eup %2022  ;;  %1784 = vmatpush3.bf16.msra.mxu0 %v695_v19 }
 0x537   : > { %v692_v22 = vmul.f32 %v2023_v20, %v2007_v48  ;;  %1795 = vmatprep.subr.bf16.mxu0 %v2260_v32 }
 0x539   : > { %v693_v23 = vpack.c.bf16 %v692_v22, %v691_v21 }
 0x53b   : > { %1786 = vmatmul.mubr.msk.bf16.vlgmr.msra.gmra.mrb[4].mxu0 %vm670_vm4, %v693_v23 }
 0x53c   : > { %1796 = vmatpush3.bf16.msra.mxu0 %v817_v24  ;;  %1797 = vmatprep.mubr.msk.bf16.mxu0 %vm2261_vm1, %v2260_v32  ;;  %v2025_v27 = vpop.eup %2024 }
 0x53d   : > { %1807 = vmatprep.subr.bf16.mxu0 %v2260_v32  ;;  %v813_v31 = vmul.f32 %v2025_v27, %v2602_v51 }
 0x560   : > { %v810_v49 = vpop.xlane.xlu1 %809 }
 0x561   : > { %2026 = vrcp.f32 %v810_v49  ;;  %v1143_v49 = vsub.s32 1, %v2562_v38 }
 0x564   : > { %v931_v25 = vpop.xlane.xlu1 %930 }
 0x565   : > { %2028 = vrcp.f32 %v931_v25  ;;  %v1144_v25 = vrot.slane %v2534_v0, %v1143_v49 }
 0x566   : > { %v928_v26 = vpop.xlane.xlu0 %927 }
 0x567   : > { %2030 = vrcp.f32 %v928_v26 }
 0x568   : > { %v1052_v28 = vpop.xlane.xlu1 %1051 }
 0x56a   : > { %v1049_v29 = vpop.xlane.xlu0 %1048 }
 0x56b   : > { %v2027_v30 = vpop.eup %2026  ;;  %2032 = vrcp.f32 %v1049_v29 }
 0x56c   : > { %v814_v33 = vmul.f32 %v2027_v30, %v2011_v5  ;;  %2034 = vrcp.f32 %v1052_v28  ;;  %v938_v39 = vpop.permute.xlu1 %937 }
 0x56e   : > { %v815_v36 = vpack.c.bf16 %v814_v33, %v813_v31  ;;  %v1059_v45 = vpop.permute.xlu0 %1058 }
 0x56f   : > { %v2029_v37 = vpop.eup %2028 }
 0x570   : > { %1798 = vmatmul.mubr.msk.bf16.vlgmr.msra.gmra.mrb[8].mxu0 %vm670_vm4, %v815_v36  ;;  %v935_v42 = vmul.f32 %v2029_v37, %v2013_v7 }
 0x571   : > { %v2031_v40 = vpop.eup %2030  ;;  %1808 = vmatpush3.bf16.msra.mxu0 %v938_v39  ;;  %1809 = vmatprep.mubr.msk.bf16.mxu0 %vm2261_vm1, %v2260_v32 }
 0x572   : > { %v934_v41 = vmul.f32 %v2031_v40, %v2015_v8  ;;  %1819 = vmatprep.subr.bf16.mxu0 %v2260_v32 }
 0x574   : > { %v936_v43 = vpack.c.bf16 %v935_v42, %v934_v41 }
 0x575   : > { %v2033_v44 = vpop.eup %2032 }
 0x576   : > { %v2035_v46 = vpop.eup %2034  ;;  %v1055_v47 = vmul.f32 %v2033_v44, %v2019_v12 }
 0x577   : > { %v1056_v48 = vmul.f32 %v2035_v46, %v2610_v10 }
 0x578   : > { %1810 = vmatmul.mubr.msk.bf16.vlgmr.msra.gmra.mrb[12].mxu0 %vm670_vm4, %v936_v43 }
 0x579   : > { %1820 = vmatpush3.bf16.msra.mxu0 %v1059_v45  ;;  %1821 = vmatprep.mubr.msk.bf16.mxu0 %vm2261_vm1, %v2260_v32  ;;  %v1057_v50 = vpack.c.bf16 %v1056_v48, %v1055_v47 }
 0x57a   : > { %1833 = vmatprep.subr.bf16.mxu0 %v2260_v32 }
 0x580   : > { %1822 = vmatmul.mubr.msk.bf16.vlgmr.msra.gmra.mrb[16].mxu0 %vm670_vm4, %v1057_v50  ;;  %v1999_v50 = vld [vmem:[%s2527_s5 + $0x8] sm:$0xff]  }
 0x581   : > { %1837 = vmatprep.mubr.msk.bf16.mxu0 %vm2261_vm1, %v2260_v32 }
 0x60e   : > { %v734_v51 = vpop.f32.mrb[4].mxu0 }
 0x60f   : > { %v1787_v52 = vpop.f32.mrb[5].mxu0 }
 0x610   : > { %v737_v53 = vpop.f32.mrb[6].mxu0 }
 0x611   : > { %v1788_v54 = vpop.f32.mrb[7].mxu0 }
 0x643   : > { %v856_v55 = vpop.f32.mrb[8].mxu0 }
 0x644   : > { %v1799_v56 = vpop.f32.mrb[9].mxu0 }
 0x645   : > { %v859_v57 = vpop.f32.mrb[10].mxu0 }
 0x646   : > { %v1979_v59 = vpack.i.bf16 %v859_v57, %v856_v55  ;;  %v1800_v60 = vpop.f32.mrb[11].mxu0  ;;  %v1232_v57 = vsub.s32 2, %v2562_v38 }
 0x648   : > { %1980 = vrot.lane.b32.xlu1 %v1979_v59, %s2273_s17  ;;  %v1233_v59 = vrot.slane %v2534_v0, %v1232_v57 }
 0x64b   : > { %v977_v61 = vpop.f32.mrb[12].mxu0 }
 0x64c   : > { %v1811_v62 = vpop.f32.mrb[13].mxu0 }
 0x64d   : > { %v980_v1 = vpop.f32.mrb[14].mxu0 }
 0x64e   : > { %v1984_v2 = vpack.i.bf16 %v980_v1, %v977_v61  ;;  %v1812_v3 = vpop.f32.mrb[15].mxu0  ;;  %v1238_v61 = vsub.s32 3, %v2562_v38 }
 0x650   : > { %1985 = vrot.lane.b32.xlu0 %v1984_v2, %s2274_s30  ;;  %v1239_v2 = vrot.slane %v2534_v0, %v1238_v61 }
 0x653   : > { %v1098_v4 = vpop.f32.mrb[16].mxu0 }
 0x654   : > { %v1823_v5 = vpop.f32.mrb[17].mxu0 }
 0x655   : > { %v1101_v6 = vpop.f32.mrb[18].mxu0 }
 0x656   : > { %v1989_v7 = vpack.i.bf16 %v1101_v6, %v1098_v4  ;;  %v1824_v8 = vpop.f32.mrb[19].mxu0 }
 0x657   : > { %v2001_v8 = vld [vmem:[%s2532_s6 + $0x8] sm:$0xff]  }
 0x658   : > { %1990 = vrot.lane.b32.xlu1 %v1989_v7, %s2275_s27  ;;  %v2000_v7 = vld [vmem:[%s2532_s6] sm:$0xff]  }
 0x6ba   : > { %v1981_v9 = vpop.permute.xlu1 %1980 }
 0x6bb   : > { %v1983_v11 = vunpack.i.h.bf16 %v1981_v9  ;;  %v1982_v12 = vunpack.i.l.bf16 %v1981_v9  ;;  %v2002_v9 = vld [vmem:[%s2532_s6 + $0x10] sm:$0xff]  }
 0x6bd   : > { %v1130_v16 = vsel %vm622_vm3, %v737_v53, %v1983_v11  ;;  %v1129_v17 = vsel %vm622_vm3, %v734_v51, %v1982_v12  ;;  %v1249_v11 = vsub.s32 4, %v2562_v38 }
 0x6bf   : > { %v1250_v12 = vrot.slane %v2534_v0, %v1249_v11 }
 0x6c2   : > { %v1986_v10 = vpop.permute.xlu0 %1985 }
 0x6c3   : > { %v1988_v13 = vunpack.i.h.bf16 %v1986_v10  ;;  %v1987_v14 = vunpack.i.l.bf16 %v1986_v10  ;;  %v2003_v10 = vld [vmem:[%s2532_s6 + $0x18] sm:$0xff]  }
 0x6c5   : > { %v1132_v20 = vsel %vm670_vm4, %v1130_v16, %v1988_v13  ;;  %v1131_v21 = vsel %vm670_vm4, %v1129_v17, %v1987_v14 }
 0x6ca   : > { %v1991_v15 = vpop.permute.xlu1 %1990 }
 0x6cb   : > { %v1993_v18 = vunpack.i.h.bf16 %v1991_v15  ;;  %v1992_v19 = vunpack.i.l.bf16 %v1991_v15 }
 0x6cd   : > { %v1135_v22 = vsel %vm1133_vm5, %v1132_v20, %v1993_v18  ;;  %v1134_v23 = vsel %vm1133_vm5, %v1131_v21, %v1992_v19 }
 0x6ce   : > { %v1140_v24 = vpack.c.bf16 %v1135_v22, %v1134_v23 }
 0x6d0   : > { %1830 = vmatmul.mubr.msk.bf16.vlgmr.msra.gmra.mrb[16].mxu1 %vm568_vm2, %v1140_v24 }
 0x6d1   : > { %1849 = vmatprep.mubr.msk.bf16.mxu1 %vm2261_vm1, %v2260_v32  ;;  %1842 = vmatpush3.bf16.msra.mxu1 %v2000_v7 }
 0x6d2   : > { %1843 = vmatprep.subr.bf16.mxu1 %v2260_v32 }
 0x6d5   : > { %1844 = vmatpush3.bf16.msra.mxu1 %v2001_v8 }
 0x6d6   : > { %1845 = vmatprep.subr.bf16.mxu1 %v2260_v32 }
 0x6d9   : > { %1846 = vmatpush3.bf16.msra.mxu1 %v2002_v9 }
 0x6da   : > { %1847 = vmatprep.subr.bf16.mxu1 %v2260_v32 }
 0x6dd   : > { %1848 = vmatpush3.bf16.msra.mxu1 %v2003_v10 }
 0x7a3   : > { %v1194_v26 = vpop.f32.mrb[16].mxu1 }
 0x7a4   : > { %v1195_v27 = vadd.f32 %v1194_v26, %v1144_v25  ;;  %v1831_v28 = vpop.f32.mrb[17].mxu1 }
 0x7a5   : > { %v1197_v29 = vpop.f32.mrb[18].mxu1 }
 0x7a6   : > { %v1198_v30 = vadd.f32 %v1197_v29, %v1144_v25  ;;  %v1832_v31 = vpop.f32.mrb[19].mxu1  ;;  %v1201_v33 = vadd.f32 %v1195_v27, %v2549_v34 }
 0x7a8   : > { %v1203_v36 = vsel %vm568_vm2, %v1201_v33, 0.0  ;;  %v1202_v37 = vadd.f32 %v1198_v30, %v2551_v35  ;;  %v1998_v35 = vld [vmem:[%s2527_s5] sm:$0xff]  }
 0x7a9   : > { %1204 = vadd.xlane.f32.xlu0 %v1203_v36  ;;  %1834 = vmatpush3.bf16.msra.mxu0 %v1998_v35 }
 0x7aa   : > { %v1206_v39 = vsel %vm568_vm2, %v1202_v37, 0.0  ;;  %1835 = vmatprep.subr.bf16.mxu0 %v2260_v32 }
 0x7ab   : > { %1207 = vadd.xlane.f32.xlu1 %v1206_v39 }
 0x7ad   : > { %1836 = vmatpush3.bf16.msra.mxu0 %v1999_v50 }
 0x836   : > { %v1205_v40 = vpop.xlane.xlu0 %1204 }
 0x837   : > { %v1210_v41 = vmul.f32 0.03125, %v1205_v40  ;;  %v1336_v40 = vsub.s32 5, %v2562_v38 }
 0x838   : > { %v1208_v42 = vpop.xlane.xlu1 %1207 }
 0x839   : > { %v1212_v43 = vsub.f32 %v1201_v33, %v1210_v41  ;;  %v1211_v44 = vmul.f32 0.03125, %v1208_v42  ;;  %v1337_v41 = vrot.slane %v2534_v0, %v1336_v40 }
 0x83b   : > { %v1213_v45 = vsub.f32 %v1202_v37, %v1211_v44  ;;  %v1214_v46 = vmul.f32 %v1212_v43, %v1212_v43 }
 0x83d   : > { %v1216_v47 = vsel %vm568_vm2, %v1214_v46, 0.0  ;;  %v1215_v34 = vmul.f32 %v1213_v45, %v1213_v45 }
 0x83e   : > { %1217 = vadd.xlane.f32.xlu0 %v1216_v47 }
 0x83f   : > { %v1219_v48 = vsel %vm568_vm2, %v1215_v34, 0.0 }
 0x842   : > { %1220 = vadd.xlane.f32.xlu0 %v1219_v48 }
 0x8cb   : > { %v1218_v51 = vpop.xlane.xlu0 %1217 }
 0x8cc   : > { %v1222_v52 = vmul.f32 0.03125, %v1218_v51 }
 0x8ce   : > { %v1224_v53 = vadd.f32 1e-12, %v1222_v52 }
 0x8cf   : > { %v1221_v54 = vpop.xlane.xlu0 %1220 }
 0x8d0   : > { %2036 = vrsqrt.f32 %v1224_v53  ;;  %v1223_v55 = vmul.f32 0.03125, %v1221_v54 }
 0x8d2   : > { %v1225_v56 = vadd.f32 1e-12, %v1223_v55 }
 0x8d4   : > { %2038 = vrsqrt.f32 %v1225_v56 }
 0x8da   : > { %v2037_v58 = vpop.eup %2036 }
 0x8db   : > { %v1228_v60 = vmul.f32 %v2037_v58, %v1212_v43 }
 0x8dd   : > { %v1234_v63 = vmul.f32 %v1233_v59, %v1228_v60 }
 0x8de   : > { %v2039_v62 = vpop.eup %2038 }
 0x8df   : > { %v1229_v1 = vmul.f32 %v2039_v62, %v1213_v45  ;;  %v1240_v4 = vadd.f32 %v1239_v2, %v1234_v63 }
 0x8e1   : > { %v1235_v3 = vmul.f32 %v1233_v59, %v1229_v1 }
 0x8e3   : > { %v1241_v5 = vadd.f32 %v1239_v2, %v1235_v3 }
 0x8e5   : > { %v1246_v6 = vpack.c.bf16 %v1241_v5, %v1240_v4 }
 0x8e7   : > { %1838 = vmatmul.mubr.msk.bf16.vlgmr.msra.gmra.mrb[20].mxu0 %vm568_vm2, %v1246_v6 }
 0x9ba   : > { %v1300_v13 = vpop.f32.mrb[20].mxu0 }
 0x9bb   : > { %v1301_v14 = vadd.f32 %v1300_v13, %v1250_v12  ;;  %v1839_v15 = vpop.f32.mrb[21].mxu0 }
 0x9bc   : > { %v1303_v16 = vpop.f32.mrb[22].mxu0 }
 0x9bd   : > { %v1309_v17 = vmul.f32 0.044715, %v1301_v14  ;;  %v1304_v18 = vadd.f32 %v1303_v16, %v1250_v12  ;;  %v1840_v19 = vpop.f32.mrb[23].mxu0  ;;  %v1307_v30 = vmul.f32 0.5, %v1301_v14  ;;  %v2276_v16 = vmov (!%p1723_p1), 0.0  }
 0x9be   : > { %1853 = vmatprep.subr.bf16.mxu0 (!%p1723_p1), %v2276_v16  ;;  %1857 = vmatprep.mubr.msk.bf16.mxu0 (!%p1723_p1), %vm2277_vm7, %v2276_v16 }
 0x9bf   : > { %v1311_v20 = vmul.f32 %v1309_v17, %v1301_v14  ;;  %v1310_v21 = vmul.f32 0.044715, %v1304_v18  ;;  %v1308_v31 = vmul.f32 0.5, %v1304_v18 }
 0x9c1   : > { %v1313_v22 = vmul.f32 %v1311_v20, %v1301_v14  ;;  %v1312_v23 = vmul.f32 %v1310_v21, %v1304_v18 }
 0x9c3   : > { %v1315_v24 = vadd.f32 %v1313_v22, %v1301_v14  ;;  %v1314_v49 = vmul.f32 %v1312_v23, %v1304_v18 }
 0x9c5   : > { %v1317_v25 = vmul.f32 0.7978846, %v1315_v24  ;;  %v1316_v32 = vadd.f32 %v1314_v49, %v1304_v18  ;;  %v1724_v18 = vld [vmem:[#allocation8 + $0x2] ss:$0 sm:$0xff] (!%p1723_p1) }
 0x9c7   : > { %2040 = vtanh.f32 %v1317_v25  ;;  %v1318_v26 = vmul.f32 0.7978846, %v1316_v32 }
 0x9c9   : > { %2042 = vtanh.f32 %v1318_v26 }
 0x9d1   : > { %v2041_v27 = vpop.eup %2040 }
 0x9d2   : > { %v1321_v28 = vadd.f32 1.0, %v2041_v27 }
 0x9d3   : > { %v2043_v29 = vpop.eup %2042 }
 0x9d4   : > { %v1322_v33 = vadd.f32 1.0, %v2043_v29  ;;  %v1323_v36 = vmul.f32 %v1321_v28, %v1307_v30 }
 0x9d6   : > { %v1324_v37 = vmul.f32 %v1322_v33, %v1308_v31 }
 0x9d8   : > { %v1333_v39 = vpack.c.bf16 %v1324_v37, %v1323_v36 }
 0x9da   : > { %1850 = vmatmul.mubr.msk.bf16.vlgmr.msra.gmra.mrb[20].mxu1 %vm1362_vm6, %v1333_v39 }
 0xaad   : > { %v1400_v42 = vpop.f32.mrb[20].mxu1 }
 0xaae   : > { %v1401_v43 = vadd.f32 %v1400_v42, %v1337_v41  ;;  %v1851_v44 = vpop.f32.mrb[21].mxu1 }
 0xaaf   : > { %v1403_v45 = vpop.f32.mrb[22].mxu1 }
 0xab0   : > { %v1404_v46 = vadd.f32 %v1403_v45, %v1337_v41  ;;  %v1852_v47 = vpop.f32.mrb[23].mxu1  ;;  %v1407_v34 = vadd.f32 %v1401_v43, %v1240_v4  ;;  %v1437_v4 = vsub.s32 6, %v2562_v38 }
 0xab2   : > { %v1409_v48 = vsel %vm568_vm2, %v1407_v34, 0.0  ;;  %v1408_v35 = vadd.f32 %v1404_v46, %v1241_v5  ;;  %v1443_v5 = vsub.s32 7, %v2562_v38  ;;  %v1438_v6 = vrot.slane %v2534_v0, %v1437_v4  ;;  %v2048_v38 = vld [vmem:[%s2772_s28] sm:$0xff] (!%p1723_p1)  }
 0xab3   : > { %1410 = vadd.xlane.f32.xlu1 %v1409_v48  ;;  %1854 = vmatpush3.bf16.msra.mxu0 (!%p1723_p1), %v2048_v38 }
 0xab4   : > { %v1412_v50 = vsel %vm568_vm2, %v1408_v35, 0.0  ;;  %v1444_v8 = vrot.slane %v2534_v0, %v1443_v5  ;;  %v2049_v0 = vld [vmem:[%s2772_s28 + $0x8] sm:$0xff] (!%p1723_p1)   ;;  %1855 = vmatprep.subr.bf16.mxu0 (!%p1723_p1), %v2276_v16 }
 0xab5   : > { %1413 = vadd.xlane.f32.xlu0 %v1412_v50 }
 0xab7   : > { %1856 = vmatpush3.bf16.msra.mxu0 (!%p1723_p1), %v2049_v0 }
 0xb40   : > { %v1411_v51 = vpop.xlane.xlu1 %1410 }
 0xb41   : > { %v1415_v52 = vmul.f32 0.03125, %v1411_v51 }
 0xb42   : > { %v1414_v53 = vpop.xlane.xlu0 %1413 }
 0xb43   : > { %v1417_v54 = vsub.f32 %v1407_v34, %v1415_v52  ;;  %v1416_v55 = vmul.f32 0.03125, %v1414_v53 }
 0xb45   : > { %v1418_v56 = vsub.f32 %v1408_v35, %v1416_v55  ;;  %v1419_v57 = vmul.f32 %v1417_v54, %v1417_v54 }
 0xb47   : > { %v1421_v58 = vsel %vm568_vm2, %v1419_v57, 0.0  ;;  %v1420_v59 = vmul.f32 %v1418_v56, %v1418_v56 }
 0xb48   : > { %1422 = vadd.xlane.f32.xlu1 %v1421_v58 }
 0xb49   : > { %v1424_v60 = vsel %vm568_vm2, %v1420_v59, 0.0 }
 0xb4a   : > { %1425 = vadd.xlane.f32.xlu0 %v1424_v60 }
 0xbd5   : > { %v1423_v61 = vpop.xlane.xlu1 %1422 }
 0xbd6   : > { %v1427_v62 = vmul.f32 0.03125, %v1423_v61 }
 0xbd7   : > { %v1426_v63 = vpop.xlane.xlu0 %1425 }
 0xbd8   : > { %v1429_v1 = vadd.f32 1e-12, %v1427_v62  ;;  %v1428_v2 = vmul.f32 0.03125, %v1426_v63 }
 0xbda   : > { %2044 = vrsqrt.f32 %v1429_v1  ;;  %v1430_v3 = vadd.f32 1e-12, %v1428_v2 }
 0xbdc   : > { %2046 = vrsqrt.f32 %v1430_v3 }
 0xbe4   : > { %v2045_v7 = vpop.eup %2044 }
 0xbe5   : > { %v1433_v9 = vmul.f32 %v2045_v7, %v1417_v54 }
 0xbe6   : > { %v2047_v10 = vpop.eup %2046 }
 0xbe7   : > { %v1439_v11 = vmul.f32 %v1438_v6, %v1433_v9  ;;  %v1434_v12 = vmul.f32 %v2047_v10, %v1418_v56  ;;  %1452 = sbr.rel (%p1723_p1) target bundleno = 3272 (0xcc8), region = 80 }
 0xbe9   : > { %v1445_v13 = vadd.f32 %v1444_v8, %v1439_v11  ;;  %v1440_v14 = vmul.f32 %v1438_v6, %v1434_v12 }
 0xbeb   : > { %1447 = vst.msk [vmem:[#allocation2] sm:$0xff] %vm568_vm2, %v1445_v13  ;;  %v1446_v15 = vadd.f32 %v1444_v8, %v1440_v14 }
 0xbed   : > { %1448 = vst.msk [vmem:[#allocation2 + $0x8] sm:$0xff] %vm568_vm2, %v1446_v15  ;;  %v1457_v17 = vpack.c.bf16 (!%p1723_p1), %v1446_v15, %v1445_v13 }
 0xbef   : > { %1858 = vmatmul.mubr.msk.bf16.vlgmr.msra.gmra.mrb[0].mxu0 %vm568_vm2, %v1457_v17 }
 0xcc2   : > { %v1512_v19 = vpop.f32.mrb[0].mxu0 }
 0xcc3   : > { %v1513_v20 = vadd.f32 %v1724_v18, %v1512_v19  ;;  %v1859_v21 = vpop.f32.mrb[1].mxu0 }
 0xcc4   : > { %v1515_v22 = vpop.f32.mrb[2].mxu0 }
 0xcc5   : > { %1519 = vst [vmem:[#allocation11] sm:$0xff] %v1513_v20  ;;  %v1516_v23 = vadd.f32 %v1724_v18, %v1515_v22  ;;  %v1860_v24 = vpop.f32.mrb[3].mxu0 }
 0xcc7   : > { %1520 = vst [vmem:[#allocation11 + $0x8] sm:$0xff] %v1516_v23 }
 0xcc8 PF: > { %s2773_s12 = sadd.s32 4294967295, %s2252_s14   ;;  %s2278_s19 = smov [#allocation11]  }
 0xcc9   : > { %p2695_p4 = scmp.eq.s32.totalorder %s2773_s12, 1  ;;  %s1530_s22 = sshll.u32 %s2278_s19, 4  ;;  %s1531_s22 = int_to_ptr.vmem [resolvable:$true] %s1530_s22 }
 0xcca   : > { %s2164_s23 = scalar_lea.vmem %s1531_s22, 256  ;;  %p2171_p11 = scmp.lt.s32.totalorder %s1531_s22, %s1531_s22 }
 0xccb   : > { %p2165_p5 = scmp.ne.s32.totalorder %s1531_s22, %s2164_s23  ;;  %p2172_p13 = scmp.lt.s32.totalorder %s2164_s23, %s2164_s23 }
 0xccd   : > { %p2166_p8 = pnand %p2165_p5, %p2695_p4  ;;  %p2173_p2 = por %p2172_p13, %p2171_p11 }
 0xccf   : > { %p2167_p10 = pneg %p2166_p8 }
 0xcd1   : > { %p2174_p3 = pnand %p2173_p2, %p2167_p10 }
 0xcd3   : > { %2177 = shalt.err (!%p2174_p3)
}
 0xcd4   : > { %s2775_s25 = sld [smem:[#allocation19_spill]] }
 0xcda   : > { %s2178_s20 = scalar_lea.hbm %s2775_s25, 256 }
 0xcdb   : > { %p2179_p0 = scmp.ne.s32.totalorder %s2775_s25, %s2178_s20  ;;  %p2184_p6 = scmp.lt.u32.totalorder %s2178_s20, %s2775_s25 }
 0xcdd   : > { %p2180_p12 = pnand %p2179_p0, %p2695_p4 }
 0xcdf   : > { %p2181_p7 = pneg %p2180_p12 }
 0xce1   : > { %p2186_p9 = pnand %p2184_p6, %p2181_p7 }
 0xce3   : > { %2189 = shalt.err (!%p2186_p9)
}
 0xce4   : > { %s2279_s7 = smov 128  }
 0xce5   : > { %1876 = dma.vmem_to_hbm [thread:$0]  (%p2695_p4), %s1531_s22, 256, %s2775_s25, [#allocation5], %s2279_s7, %s2279_s7, %s2273_s17  }
 0xce6   : > { %2227 = dma.done.wait (%p2695_p4), [#allocation5], 256  }
 0xce7   : > { %2229 = vsyncadd (%p2695_p4), [#allocation5], 4294967040 }
 0xce8 PF: > { %s25_s14 = sadd.s32 1, %s2252_s14   ;;  %s2776_s30 = smov %s2236_s10 }
 0xce9   : > { %p22_p1 = scmp.ge.s32.totalorder %s25_s14, 4   ;;  %s2777_s10 = smov %s2240_s11 }
 0xcea   : > { %s2778_s11 = smov %s2459_s9  ;;  %s2779_s12 = smov %s2248_s13 }
 0xceb   : > { %s2780_s13 = smov %s2782_s29  ;;  %24 = sbr.rel (!%p22_p1) target bundleno = 12 (0xc), region = 129 }
 0xcf2   :  { %1546 = vsyncpa [#allocation4], 1 }
 0xcf3   :  { %1548 = vsyncpa [#allocation4 + $0x1], 1 }
 0xcf4   :  { %1549 = vsyncpa [#allocation7], 1 }
 0xcf5   :  { %1550 = vsyncpa [#allocation10], 1 }
 0xcf6   :  { %1552 = vsyncpa [#allocation10 + $0x1], 1 }
 0xcf7   :  { %1553 = vsyncpa [#allocation5], 1 }
 0xcf8   :  { %1555 = vsyncpa [#allocation5 + $0x1], 1 }

</bundles_post_ra>
